<compile_context>
chip_gen: v5e
topology: v5e:2x2
jax: 0.10.0
libtpu: 0.0.40
codegen_flags: <defaults>
</compile_context>

<pallas_src>
import functools
import math

import jax
import jax.numpy as jnp
from jax.experimental import pallas as pl
from jax.experimental.pallas import tpu as pltpu


# ----------------------------------------------------------------------------
# kernel
# ----------------------------------------------------------------------------
def encoder_layer_kernel(
    xq_ref, xf_ref, mask_ref,
    ln1a_ref, ln1b_ref,
    wq_ref, bq_ref, wk_ref, bk_ref, wv_ref, bv_ref, wo_ref, bo_ref,
    ln2a_ref, ln2b_ref,
    w1_ref, b1_ref, w2_ref, b2_ref,
    out_ref,
    *, num_heads, eps, approx,
):
    f32 = jnp.float32
    xq = xq_ref[0]                       # (tq, D) query rows / residual stream
    xf = xf_ref[0]                       # (S,  D) full sequence (key/value source)
    tq, D = xq.shape
    S = xf.shape[0]
    H = num_heads
    dk = D // H
    cdt = wq_ref.dtype                   # matmul input dtype (f32 or bf16)
    scale = 1.0 / math.sqrt(dk)

    def layer_norm(x, a, b):
        # torch: a*(x-mean)/(std+eps)+b with unbiased std; fused one-pass stats.
        n = x.shape[-1]
        ex = jnp.mean(x, axis=-1, keepdims=True)
        ex2 = jnp.mean(x * x, axis=-1, keepdims=True)
        var = jnp.maximum(ex2 - ex * ex, 0.0) * (n / (n - 1.0))
        inv = pl.reciprocal(jnp.sqrt(var) + eps, approx=approx)   # EUP, not VALU div
        return (x - ex) * inv * a + b

    # ---- sublayer 0: self-attention over LayerNorm(x) -----------------------
    xn_f = layer_norm(xf, ln1a_ref[...], ln1b_ref[...])           # (S, D)
    xn_q = xn_f if tq == S else layer_norm(xq, ln1a_ref[...], ln1b_ref[...])

    xn_fc = xn_f.astype(cdt)
    xn_qc = xn_q.astype(cdt)

    # full-width projections (MXU-dense); f32 accumulation
    q = jnp.dot(xn_qc, wq_ref[...], preferred_element_type=f32) + bq_ref[...]
    k = jnp.dot(xn_fc, wk_ref[...], preferred_element_type=f32) + bk_ref[...]
    v = jnp.dot(xn_fc, wv_ref[...], preferred_element_type=f32) + bv_ref[...]
    q = q * scale                        # fold 1/sqrt(dk) into Q (cheaper than scores)
    vc = v.astype(cdt)

    # additive mask bias, computed once, broadcast over heads & queries
    bias = jnp.where(mask_ref[0] > 0, 0.0, -1e9).astype(f32)      # (1, S)

    attn_acc = jnp.zeros((tq, D), f32)
    for h in range(H):                   # static, unrolled head loop
        sl = slice(h * dk, (h + 1) * dk)
        qh = q[:, sl].astype(cdt)                                  # (tq, dk)
        kh = k[:, sl].astype(cdt)                                  # (S,  dk)
        s = jnp.einsum("qd,kd->qk", qh, kh,
                       preferred_element_type=f32) + bias          # (tq, S)
        s = s - jnp.max(s, axis=-1, keepdims=True)
        p = jnp.exp(s)
        p = p * pl.reciprocal(jnp.sum(p, axis=-1, keepdims=True), approx=approx)
        ctx = jnp.dot(p.astype(cdt), vc[:, sl],
                      preferred_element_type=f32)                  # (tq, dk)
        # accumulate the output projection per head: no lane concat, no masked stores
        attn_acc = attn_acc + jnp.dot(ctx.astype(cdt), wo_ref[h],
                                      preferred_element_type=f32)  # (tq, D)

    # dropout is identity in eval / deterministic mode
    x1 = xq + attn_acc + bo_ref[...]

    # ---- sublayer 1: position-wise FFN over LayerNorm(x1) -------------------
    yn = layer_norm(x1, ln2a_ref[...], ln2b_ref[...]).astype(cdt)
    h1 = jnp.dot(yn, w1_ref[...], preferred_element_type=f32) + b1_ref[...]
    h1 = jnp.maximum(h1, 0.0)
    ff = jnp.dot(h1.astype(cdt), w2_ref[...], preferred_element_type=f32) + b2_ref[...]

    out_ref[0] = (x1 + ff).astype(out_ref.dtype)


# ----------------------------------------------------------------------------
# wrapper
# ----------------------------------------------------------------------------
def _vmem_capacity_bytes():
    try:
        return int(pltpu.get_tpu_info().vmem_capacity_bytes)
    except Exception:
        return 64 * 1024 * 1024          # conservative (v7x per-core VMEM)


def _vmem_estimate(S, tq, D, DFF, w_bytes):
    f = 4  # f32 bytes
    blocks = 2 * f * (tq * D + S * D + S + tq * D)    # x_q, x_full, mask, out (2x buffers)
    weights = 2 * w_bytes                             # params are double-buffered too
    temps = f * (5 * S * D + 4 * tq * D + 3 * tq * S + tq * DFF)
    return blocks + weights + temps


def _pick_q_tile(S, D, DFF, w_bytes, budget):
    cands = [t for t in (256, 512, 128, 1024, 64, 32, 16, 8) if t < S and S % t == 0]
    cands.append(S)
    fitting = [t for t in cands if _vmem_estimate(S, t, D, DFF, w_bytes) <= budget]
    return fitting[0] if fitting else min(cands)


def encoder_layer(x, mask, params, *, num_heads, eps=1e-6,
                  use_bf16_matmuls=False, approx_reciprocal=None):
    B, S, D = x.shape
    DFF = params["w1"].shape[-1]
    H = num_heads
    assert D % H == 0
    dk = D // H
    if approx_reciprocal is None:
        approx_reciprocal = use_bf16_matmuls
    mm_dt = jnp.bfloat16 if use_bf16_matmuls else jnp.float32

    # host-side head split of the output projection (rows h*dk:(h+1)*dk of W_o)
    wo_heads = params["wo"].reshape(H, dk, D)

    param_list = [
        params["ln1_a"], params["ln1_b"],
        params["wq"].astype(mm_dt), params["bq"],
        params["wk"].astype(mm_dt), params["bk"],
        params["wv"].astype(mm_dt), params["bv"],
        wo_heads.astype(mm_dt),     params["bo"],
        params["ln2_a"], params["ln2_b"],
        params["w1"].astype(mm_dt), params["b1"],
        params["w2"].astype(mm_dt), params["b2"],
    ]
    w_bytes = sum(int(p.size) * p.dtype.itemsize for p in param_list)

    vmem_cap = _vmem_capacity_bytes()
    tq = _pick_q_tile(S, D, DFF, w_bytes, budget=int(0.7 * vmem_cap))
    est = _vmem_estimate(S, tq, D, DFF, w_bytes)
    vmem_limit = int(min(vmem_cap, max(32 * 1024 * 1024, 2 * est)))

    grid = (B, S // tq)

    def full_spec(shape):
        n = len(shape)
        return pl.BlockSpec(shape, lambda b, qi, _n=n: (0,) * _n)

    in_specs = [
        pl.BlockSpec((1, tq, D), lambda b, qi: (b, qi, 0)),   # x: query tile / residual
        pl.BlockSpec((1, S, D), lambda b, qi: (b, 0, 0)),     # x: full seq (K/V source)
        pl.BlockSpec((1, 1, S), lambda b, qi: (b, 0, 0)),     # mask
    ] + [full_spec(p.shape) for p in param_list]
    out_specs = pl.BlockSpec((1, tq, D), lambda b, qi: (b, qi, 0))

    flops = int(2 * B * S * (4 * D * D + 2 * S * D + 2 * D * DFF))
    transcendentals = int(B * H * S * S + 4 * B * S)
    bytes_accessed = int(4 * (3 * B * S * D + B * S) + w_bytes)

    kernel = functools.partial(encoder_layer_kernel, num_heads=H, eps=eps,
                               approx=approx_reciprocal)

    return pl.pallas_call(
        kernel,
        out_shape=jax.ShapeDtypeStruct((B, S, D), jnp.float32),
        grid_spec=pltpu.PrefetchScalarGridSpec(
            num_scalar_prefetch=0,
            grid=grid,
            in_specs=in_specs,
            out_specs=out_specs,
        ),
        compiler_params=pltpu.CompilerParams(
            dimension_semantics=("parallel", "parallel"),
            vmem_limit_bytes=vmem_limit,
        ),
        cost_estimate=pl.CostEstimate(
            flops=flops,
            transcendentals=transcendentals,
            bytes_accessed=bytes_accessed,
        ),
    )(x, x, mask, *param_list)


# ------------------------- pure-JAX reference (for sanity) -------------------
def reference(x, mask, params, *, num_heads, eps=1e-6):
    def ln(x, a, b):
        D = x.shape[-1]
        mean = jnp.mean(x, axis=-1, keepdims=True)
        var = jnp.sum((x - mean) ** 2, axis=-1, keepdims=True) / (D - 1)
        return a * (x - mean) / (jnp.sqrt(var) + eps) + b

    B, S, D = x.shape
    dk = D // num_heads
    xn = ln(x, params["ln1_a"], params["ln1_b"])
    q = xn @ params["wq"] + params["bq"]
    k = xn @ params["wk"] + params["bk"]
    v = xn @ params["wv"] + params["bv"]
    q = q.reshape(B, S, num_heads, dk).transpose(0, 2, 1, 3)
    k = k.reshape(B, S, num_heads, dk).transpose(0, 2, 1, 3)
    v = v.reshape(B, S, num_heads, dk).transpose(0, 2, 1, 3)
    scores = jnp.einsum("bhqd,bhkd->bhqk", q, k) / math.sqrt(dk)
    scores = jnp.where(mask[:, None, :, :] > 0, scores, -1e9)
    p = jax.nn.softmax(scores, axis=-1)
    att = jnp.einsum("bhqk,bhkd->bhqd", p, v).transpose(0, 2, 1, 3).reshape(B, S, D)
    x1 = x + (att @ params["wo"] + params["bo"])
    yn = ln(x1, params["ln2_a"], params["ln2_b"])
    ff = jnp.maximum(yn @ params["w1"] + params["b1"], 0.0) @ params["w2"] + params["b2"]
    return x1 + ff


if __name__ == "__main__":
    B, S, D, H, DFF = 2, 8, 32, 4, 64

    root = jax.random.PRNGKey(0)
    keys = jax.random.split(root, 18)

    def nrm(k, shape, scale=0.05):
        return scale * jax.random.normal(k, shape, dtype=jnp.float32)

    params = {
        "ln1_a": 1.0 + nrm(keys[0], (1, D)), "ln1_b": nrm(keys[1], (1, D)),
        "wq": nrm(keys[2], (D, D)), "bq": nrm(keys[3], (1, D)),
        "wk": nrm(keys[4], (D, D)), "bk": nrm(keys[5], (1, D)),
        "wv": nrm(keys[6], (D, D)), "bv": nrm(keys[7], (1, D)),
        "wo": nrm(keys[8], (D, D)), "bo": nrm(keys[9], (1, D)),
        "ln2_a": 1.0 + nrm(keys[10], (1, D)), "ln2_b": nrm(keys[11], (1, D)),
        "w1": nrm(keys[12], (D, DFF)), "b1": nrm(keys[13], (1, DFF)),
        "w2": nrm(keys[14], (DFF, D)), "b2": nrm(keys[15], (1, D)),
    }

    x = jax.random.normal(keys[16], (B, S, D), dtype=jnp.float32)
    mask = jnp.ones((B, 1, S), dtype=jnp.float32)
    mask = mask.at[1, 0, 6:].set(0.0)   # mask out last two keys of batch element 1

    ref = reference(x, mask, params, num_heads=H)

    # exact path (f32 matmul inputs): must match the reference tightly
    out_f32 = jax.block_until_ready(encoder_layer(x, mask, params, num_heads=H))
    assert out_f32.shape == (B, S, D)
    err = float(jnp.max(jnp.abs(out_f32 - ref)))
    assert err < 1e-4, f"f32 kernel mismatch vs reference: {err}"

    # fast path: bf16 matmul inputs (f32 accumulation) + EUP approx reciprocals
    out_bf16 = jax.block_until_ready(
        encoder_layer(x, mask, params, num_heads=H, use_bf16_matmuls=True))
    err16 = float(jnp.max(jnp.abs(out_bf16 - ref)))
    assert err16 < 5e-2, f"bf16 kernel diverged from reference: {err16}"

    print("KERNEL_OK")
</pallas_src>

<mosaic_0001>
module attributes {stable_mosaic.version = 11 : i64} {
  func.func @encoder_layer_kernel(%arg0: i32, %arg1: i32, %arg2: memref<1x8x32xf32, #tpu.memory_space<vmem>>, %arg3: memref<1x8x32xf32, #tpu.memory_space<vmem>>, %arg4: memref<1x1x8xf32, #tpu.memory_space<vmem>>, %arg5: memref<1x32xf32, #tpu.memory_space<vmem>>, %arg6: memref<1x32xf32, #tpu.memory_space<vmem>>, %arg7: memref<32x32xf32, #tpu.memory_space<vmem>>, %arg8: memref<1x32xf32, #tpu.memory_space<vmem>>, %arg9: memref<32x32xf32, #tpu.memory_space<vmem>>, %arg10: memref<1x32xf32, #tpu.memory_space<vmem>>, %arg11: memref<32x32xf32, #tpu.memory_space<vmem>>, %arg12: memref<1x32xf32, #tpu.memory_space<vmem>>, %arg13: memref<4x8x32xf32, #tpu.memory_space<vmem>>, %arg14: memref<1x32xf32, #tpu.memory_space<vmem>>, %arg15: memref<1x32xf32, #tpu.memory_space<vmem>>, %arg16: memref<1x32xf32, #tpu.memory_space<vmem>>, %arg17: memref<32x64xf32, #tpu.memory_space<vmem>>, %arg18: memref<1x64xf32, #tpu.memory_space<vmem>>, %arg19: memref<64x32xf32, #tpu.memory_space<vmem>>, %arg20: memref<1x32xf32, #tpu.memory_space<vmem>>, %arg21: memref<1x8x32xf32, #tpu.memory_space<vmem>>) attributes {dimension_semantics = [#tpu.dimension_semantics<parallel>, #tpu.dimension_semantics<parallel>], iteration_bounds = array<i64: 2, 1>, scalar_prefetch = 0 : i64, scratch_operands = 0 : i64, tpu.core_type = #tpu.core_type<tc>, window_params = [{transform_indices = @transform_0, window_bounds = array<i64: 1, 8, 32>}, {transform_indices = @transform_1, window_bounds = array<i64: 1, 8, 32>}, {transform_indices = @transform_2, window_bounds = array<i64: 1, 1, 8>}, {pipeline_mode = #tpu.pipeline_mode<synchronous>, transform_indices = @transform_3, window_bounds = array<i64: 1, 32>}, {pipeline_mode = #tpu.pipeline_mode<synchronous>, transform_indices = @transform_4, window_bounds = array<i64: 1, 32>}, {pipeline_mode = #tpu.pipeline_mode<synchronous>, transform_indices = @transform_5, window_bounds = array<i64: 32, 32>}, {pipeline_mode = #tpu.pipeline_mode<synchronous>, transform_indices = @transform_6, window_bounds = array<i64: 1, 32>}, {pipeline_mode = #tpu.pipeline_mode<synchronous>, transform_indices = @transform_7, window_bounds = array<i64: 32, 32>}, {pipeline_mode = #tpu.pipeline_mode<synchronous>, transform_indices = @transform_8, window_bounds = array<i64: 1, 32>}, {pipeline_mode = #tpu.pipeline_mode<synchronous>, transform_indices = @transform_9, window_bounds = array<i64: 32, 32>}, {pipeline_mode = #tpu.pipeline_mode<synchronous>, transform_indices = @transform_10, window_bounds = array<i64: 1, 32>}, {pipeline_mode = #tpu.pipeline_mode<synchronous>, transform_indices = @transform_11, window_bounds = array<i64: 4, 8, 32>}, {pipeline_mode = #tpu.pipeline_mode<synchronous>, transform_indices = @transform_12, window_bounds = array<i64: 1, 32>}, {pipeline_mode = #tpu.pipeline_mode<synchronous>, transform_indices = @transform_13, window_bounds = array<i64: 1, 32>}, {pipeline_mode = #tpu.pipeline_mode<synchronous>, transform_indices = @transform_14, window_bounds = array<i64: 1, 32>}, {pipeline_mode = #tpu.pipeline_mode<synchronous>, transform_indices = @transform_15, window_bounds = array<i64: 32, 64>}, {pipeline_mode = #tpu.pipeline_mode<synchronous>, transform_indices = @transform_16, window_bounds = array<i64: 1, 64>}, {pipeline_mode = #tpu.pipeline_mode<synchronous>, transform_indices = @transform_17, window_bounds = array<i64: 64, 32>}, {pipeline_mode = #tpu.pipeline_mode<synchronous>, transform_indices = @transform_18, window_bounds = array<i64: 1, 32>}, {transform_indices = @transform_19, window_bounds = array<i64: 1, 8, 32>}]} {
    %c0 = arith.constant 0 : index
    %c0_0 = arith.constant 0 : index
    %c0_1 = arith.constant 0 : index
    %0 = vector.load %arg2[%c0, %c0_0, %c0_1] : memref<1x8x32xf32, #tpu.memory_space<vmem>>, vector<1x8x32xf32>
    %1 = vector.shape_cast %0 : vector<1x8x32xf32> to vector<8x32xf32>
    %c0_2 = arith.constant 0 : index
    %c0_3 = arith.constant 0 : index
    %c0_4 = arith.constant 0 : index
    %2 = vector.load %arg3[%c0_2, %c0_3, %c0_4] : memref<1x8x32xf32, #tpu.memory_space<vmem>>, vector<1x8x32xf32>
    %3 = vector.shape_cast %2 : vector<1x8x32xf32> to vector<8x32xf32>
    %c0_5 = arith.constant 0 : index
    %c0_6 = arith.constant 0 : index
    %4 = vector.load %arg5[%c0_5, %c0_6] : memref<1x32xf32, #tpu.memory_space<vmem>>, vector<1x32xf32>
    %c0_7 = arith.constant 0 : index
    %c0_8 = arith.constant 0 : index
    %5 = vector.load %arg6[%c0_7, %c0_8] : memref<1x32xf32, #tpu.memory_space<vmem>>, vector<1x32xf32>
    %cst = arith.constant dense<0.000000e+00> : vector<8xf32>
    %6 = vector.multi_reduction <add>, %3, %cst [1] : vector<8x32xf32> to vector<8xf32>
    %7 = vector.shape_cast %6 : vector<8xf32> to vector<8x1xf32>
    %cst_9 = arith.constant 3.200000e+01 : f32
    %8 = vector.broadcast %cst_9 : f32 to vector<8x1xf32>
    %9 = arith.divf %7, %8 : vector<8x1xf32>
    %10 = arith.mulf %3, %3 : vector<8x32xf32>
    %cst_10 = arith.constant dense<0.000000e+00> : vector<8xf32>
    %11 = vector.multi_reduction <add>, %10, %cst_10 [1] : vector<8x32xf32> to vector<8xf32>
    %12 = vector.shape_cast %11 : vector<8xf32> to vector<8x1xf32>
    %cst_11 = arith.constant 3.200000e+01 : f32
    %13 = vector.broadcast %cst_11 : f32 to vector<8x1xf32>
    %14 = arith.divf %12, %13 : vector<8x1xf32>
    %15 = arith.mulf %9, %9 : vector<8x1xf32>
    %16 = arith.subf %14, %15 : vector<8x1xf32>
    %cst_12 = arith.constant 0.000000e+00 : f32
    %17 = vector.broadcast %cst_12 : f32 to vector<8x1xf32>
    %18 = arith.maximumf %16, %17 : vector<8x1xf32>
    %cst_13 = arith.constant 1.03225803 : f32
    %19 = vector.broadcast %cst_13 : f32 to vector<8x1xf32>
    %20 = arith.mulf %18, %19 : vector<8x1xf32>
    %21 = math.sqrt %20 : vector<8x1xf32>
    %cst_14 = arith.constant 9.99999997E-7 : f32
    %22 = vector.broadcast %cst_14 : f32 to vector<8x1xf32>
    %23 = arith.addf %21, %22 : vector<8x1xf32>
    %24 = tpu.reciprocal %23 : vector<8x1xf32> -> vector<8x1xf32>
    %25 = vector.broadcast %9 : vector<8x1xf32> to vector<8x32xf32>
    %26 = arith.subf %3, %25 : vector<8x32xf32>
    %27 = vector.broadcast %24 : vector<8x1xf32> to vector<8x32xf32>
    %28 = arith.mulf %26, %27 : vector<8x32xf32>
    %29 = vector.broadcast %4 : vector<1x32xf32> to vector<8x32xf32>
    %30 = arith.mulf %28, %29 : vector<8x32xf32>
    %31 = vector.broadcast %5 : vector<1x32xf32> to vector<8x32xf32>
    %32 = arith.addf %30, %31 : vector<8x32xf32>
    %c0_15 = arith.constant 0 : index
    %c0_16 = arith.constant 0 : index
    %33 = vector.load %arg7[%c0_15, %c0_16] : memref<32x32xf32, #tpu.memory_space<vmem>>, vector<32x32xf32>
    %cst_17 = arith.constant dense<0.000000e+00> : vector<8x32xf32>
    %34 = tpu.matmul %32, %33, %cst_17 {dimension_numbers = #tpu.dot_dimension_numbers<[1], [0], [0], [1], [0, 0, 1, 1], [], []>} : vector<8x32xf32>, vector<32x32xf32>, vector<8x32xf32> -> vector<8x32xf32>
    %c0_18 = arith.constant 0 : index
    %c0_19 = arith.constant 0 : index
    %35 = vector.load %arg8[%c0_18, %c0_19] : memref<1x32xf32, #tpu.memory_space<vmem>>, vector<1x32xf32>
    %36 = vector.broadcast %35 : vector<1x32xf32> to vector<8x32xf32>
    %37 = arith.addf %34, %36 : vector<8x32xf32>
    %c0_20 = arith.constant 0 : index
    %c0_21 = arith.constant 0 : index
    %38 = vector.load %arg9[%c0_20, %c0_21] : memref<32x32xf32, #tpu.memory_space<vmem>>, vector<32x32xf32>
    %cst_22 = arith.constant dense<0.000000e+00> : vector<8x32xf32>
    %39 = tpu.matmul %32, %38, %cst_22 {dimension_numbers = #tpu.dot_dimension_numbers<[1], [0], [0], [1], [0, 0, 1, 1], [], []>} : vector<8x32xf32>, vector<32x32xf32>, vector<8x32xf32> -> vector<8x32xf32>
    %c0_23 = arith.constant 0 : index
    %c0_24 = arith.constant 0 : index
    %40 = vector.load %arg10[%c0_23, %c0_24] : memref<1x32xf32, #tpu.memory_space<vmem>>, vector<1x32xf32>
    %41 = vector.broadcast %40 : vector<1x32xf32> to vector<8x32xf32>
    %42 = arith.addf %39, %41 : vector<8x32xf32>
    %c0_25 = arith.constant 0 : index
    %c0_26 = arith.constant 0 : index
    %43 = vector.load %arg11[%c0_25, %c0_26] : memref<32x32xf32, #tpu.memory_space<vmem>>, vector<32x32xf32>
    %cst_27 = arith.constant dense<0.000000e+00> : vector<8x32xf32>
    %44 = tpu.matmul %32, %43, %cst_27 {dimension_numbers = #tpu.dot_dimension_numbers<[1], [0], [0], [1], [0, 0, 1, 1], [], []>} : vector<8x32xf32>, vector<32x32xf32>, vector<8x32xf32> -> vector<8x32xf32>
    %c0_28 = arith.constant 0 : index
    %c0_29 = arith.constant 0 : index
    %45 = vector.load %arg12[%c0_28, %c0_29] : memref<1x32xf32, #tpu.memory_space<vmem>>, vector<1x32xf32>
    %46 = vector.broadcast %45 : vector<1x32xf32> to vector<8x32xf32>
    %47 = arith.addf %44, %46 : vector<8x32xf32>
    %cst_30 = arith.constant 0.353553385 : f32
    %48 = vector.broadcast %cst_30 : f32 to vector<8x32xf32>
    %49 = arith.mulf %37, %48 : vector<8x32xf32>
    %c0_31 = arith.constant 0 : index
    %c0_32 = arith.constant 0 : index
    %c0_33 = arith.constant 0 : index
    %50 = vector.load %arg4[%c0_31, %c0_32, %c0_33] : memref<1x1x8xf32, #tpu.memory_space<vmem>>, vector<1x1x8xf32>
    %51 = vector.shape_cast %50 : vector<1x1x8xf32> to vector<1x8xf32>
    %cst_34 = arith.constant 0.000000e+00 : f32
    %52 = vector.broadcast %cst_34 : f32 to vector<1x8xf32>
    %53 = arith.cmpf ogt, %51, %52 : vector<1x8xf32>
    %cst_35 = arith.constant 0.000000e+00 : f32
    %cst_36 = arith.constant -1.000000e+09 : f32
    %54 = vector.broadcast %cst_35 : f32 to vector<1x8xf32>
    %55 = vector.broadcast %cst_36 : f32 to vector<1x8xf32>
    %56 = arith.select %53, %54, %55 : vector<1x8xi1>, vector<1x8xf32>
    %cst_37 = arith.constant 0.000000e+00 : f32
    %57 = vector.broadcast %cst_37 : f32 to vector<8x32xf32>
    %58 = vector.extract_strided_slice %49 {offsets = [0, 0], sizes = [8, 8], strides = [1, 1]} : vector<8x32xf32> to vector<8x8xf32>
    %59 = vector.extract_strided_slice %42 {offsets = [0, 0], sizes = [8, 8], strides = [1, 1]} : vector<8x32xf32> to vector<8x8xf32>
    "tpu.trace_start"() <{level = 10 : i32, message = "qd,kd->qk"}> : () -> ()
    %cst_38 = arith.constant dense<0.000000e+00> : vector<8x8xf32>
    %60 = tpu.matmul %58, %59, %cst_38 {dimension_numbers = #tpu.dot_dimension_numbers<[1], [1], [0], [0], [0, 0, 1, 0], [], []>} : vector<8x8xf32>, vector<8x8xf32>, vector<8x8xf32> -> vector<8x8xf32>
    "tpu.trace_stop"() : () -> ()
    %61 = vector.broadcast %56 : vector<1x8xf32> to vector<8x8xf32>
    %62 = arith.addf %60, %61 : vector<8x8xf32>
    %cst_39 = arith.constant dense<0xFF800000> : vector<8xf32>
    %63 = vector.multi_reduction <maximumf>, %62, %cst_39 [1] : vector<8x8xf32> to vector<8xf32>
    %64 = vector.shape_cast %63 : vector<8xf32> to vector<8x1xf32>
    %65 = vector.broadcast %64 : vector<8x1xf32> to vector<8x8xf32>
    %66 = arith.subf %62, %65 : vector<8x8xf32>
    %67 = math.exp %66 : vector<8x8xf32>
    %cst_40 = arith.constant dense<0.000000e+00> : vector<8xf32>
    %68 = vector.multi_reduction <add>, %67, %cst_40 [1] : vector<8x8xf32> to vector<8xf32>
    %69 = vector.shape_cast %68 : vector<8xf32> to vector<8x1xf32>
    %70 = tpu.reciprocal %69 : vector<8x1xf32> -> vector<8x1xf32>
    %71 = vector.broadcast %70 : vector<8x1xf32> to vector<8x8xf32>
    %72 = arith.mulf %67, %71 : vector<8x8xf32>
    %73 = vector.extract_strided_slice %47 {offsets = [0, 0], sizes = [8, 8], strides = [1, 1]} : vector<8x32xf32> to vector<8x8xf32>
    %cst_41 = arith.constant dense<0.000000e+00> : vector<8x8xf32>
    %74 = tpu.matmul %72, %73, %cst_41 {dimension_numbers = #tpu.dot_dimension_numbers<[1], [0], [0], [1], [0, 0, 1, 1], [], []>} : vector<8x8xf32>, vector<8x8xf32>, vector<8x8xf32> -> vector<8x8xf32>
    %c0_42 = arith.constant 0 : index
    %c0_43 = arith.constant 0 : index
    %c0_44 = arith.constant 0 : index
    %75 = vector.load %arg13[%c0_42, %c0_43, %c0_44] : memref<4x8x32xf32, #tpu.memory_space<vmem>>, vector<1x8x32xf32>
    %76 = vector.shape_cast %75 : vector<1x8x32xf32> to vector<8x32xf32>
    %cst_45 = arith.constant dense<0.000000e+00> : vector<8x32xf32>
    %77 = tpu.matmul %74, %76, %cst_45 {dimension_numbers = #tpu.dot_dimension_numbers<[1], [0], [0], [1], [0, 0, 1, 1], [], []>} : vector<8x8xf32>, vector<8x32xf32>, vector<8x32xf32> -> vector<8x32xf32>
    %78 = arith.addf %57, %77 : vector<8x32xf32>
    %79 = vector.extract_strided_slice %49 {offsets = [0, 8], sizes = [8, 8], strides = [1, 1]} : vector<8x32xf32> to vector<8x8xf32>
    %80 = vector.extract_strided_slice %42 {offsets = [0, 8], sizes = [8, 8], strides = [1, 1]} : vector<8x32xf32> to vector<8x8xf32>
    "tpu.trace_start"() <{level = 10 : i32, message = "qd,kd->qk"}> : () -> ()
    %cst_46 = arith.constant dense<0.000000e+00> : vector<8x8xf32>
    %81 = tpu.matmul %79, %80, %cst_46 {dimension_numbers = #tpu.dot_dimension_numbers<[1], [1], [0], [0], [0, 0, 1, 0], [], []>} : vector<8x8xf32>, vector<8x8xf32>, vector<8x8xf32> -> vector<8x8xf32>
    "tpu.trace_stop"() : () -> ()
    %82 = vector.broadcast %56 : vector<1x8xf32> to vector<8x8xf32>
    %83 = arith.addf %81, %82 : vector<8x8xf32>
    %cst_47 = arith.constant dense<0xFF800000> : vector<8xf32>
    %84 = vector.multi_reduction <maximumf>, %83, %cst_47 [1] : vector<8x8xf32> to vector<8xf32>
    %85 = vector.shape_cast %84 : vector<8xf32> to vector<8x1xf32>
    %86 = vector.broadcast %85 : vector<8x1xf32> to vector<8x8xf32>
    %87 = arith.subf %83, %86 : vector<8x8xf32>
    %88 = math.exp %87 : vector<8x8xf32>
    %cst_48 = arith.constant dense<0.000000e+00> : vector<8xf32>
    %89 = vector.multi_reduction <add>, %88, %cst_48 [1] : vector<8x8xf32> to vector<8xf32>
    %90 = vector.shape_cast %89 : vector<8xf32> to vector<8x1xf32>
    %91 = tpu.reciprocal %90 : vector<8x1xf32> -> vector<8x1xf32>
    %92 = vector.broadcast %91 : vector<8x1xf32> to vector<8x8xf32>
    %93 = arith.mulf %88, %92 : vector<8x8xf32>
    %94 = vector.extract_strided_slice %47 {offsets = [0, 8], sizes = [8, 8], strides = [1, 1]} : vector<8x32xf32> to vector<8x8xf32>
    %cst_49 = arith.constant dense<0.000000e+00> : vector<8x8xf32>
    %95 = tpu.matmul %93, %94, %cst_49 {dimension_numbers = #tpu.dot_dimension_numbers<[1], [0], [0], [1], [0, 0, 1, 1], [], []>} : vector<8x8xf32>, vector<8x8xf32>, vector<8x8xf32> -> vector<8x8xf32>
    %c1 = arith.constant 1 : index
    %c0_50 = arith.constant 0 : index
    %c0_51 = arith.constant 0 : index
    %96 = vector.load %arg13[%c1, %c0_50, %c0_51] : memref<4x8x32xf32, #tpu.memory_space<vmem>>, vector<1x8x32xf32>
    %97 = vector.shape_cast %96 : vector<1x8x32xf32> to vector<8x32xf32>
    %cst_52 = arith.constant dense<0.000000e+00> : vector<8x32xf32>
    %98 = tpu.matmul %95, %97, %cst_52 {dimension_numbers = #tpu.dot_dimension_numbers<[1], [0], [0], [1], [0, 0, 1, 1], [], []>} : vector<8x8xf32>, vector<8x32xf32>, vector<8x32xf32> -> vector<8x32xf32>
    %99 = arith.addf %78, %98 : vector<8x32xf32>
    %100 = vector.extract_strided_slice %49 {offsets = [0, 16], sizes = [8, 8], strides = [1, 1]} : vector<8x32xf32> to vector<8x8xf32>
    %101 = vector.extract_strided_slice %42 {offsets = [0, 16], sizes = [8, 8], strides = [1, 1]} : vector<8x32xf32> to vector<8x8xf32>
    "tpu.trace_start"() <{level = 10 : i32, message = "qd,kd->qk"}> : () -> ()
    %cst_53 = arith.constant dense<0.000000e+00> : vector<8x8xf32>
    %102 = tpu.matmul %100, %101, %cst_53 {dimension_numbers = #tpu.dot_dimension_numbers<[1], [1], [0], [0], [0, 0, 1, 0], [], []>} : vector<8x8xf32>, vector<8x8xf32>, vector<8x8xf32> -> vector<8x8xf32>
    "tpu.trace_stop"() : () -> ()
    %103 = vector.broadcast %56 : vector<1x8xf32> to vector<8x8xf32>
    %104 = arith.addf %102, %103 : vector<8x8xf32>
    %cst_54 = arith.constant dense<0xFF800000> : vector<8xf32>
    %105 = vector.multi_reduction <maximumf>, %104, %cst_54 [1] : vector<8x8xf32> to vector<8xf32>
    %106 = vector.shape_cast %105 : vector<8xf32> to vector<8x1xf32>
    %107 = vector.broadcast %106 : vector<8x1xf32> to vector<8x8xf32>
    %108 = arith.subf %104, %107 : vector<8x8xf32>
    %109 = math.exp %108 : vector<8x8xf32>
    %cst_55 = arith.constant dense<0.000000e+00> : vector<8xf32>
    %110 = vector.multi_reduction <add>, %109, %cst_55 [1] : vector<8x8xf32> to vector<8xf32>
    %111 = vector.shape_cast %110 : vector<8xf32> to vector<8x1xf32>
    %112 = tpu.reciprocal %111 : vector<8x1xf32> -> vector<8x1xf32>
    %113 = vector.broadcast %112 : vector<8x1xf32> to vector<8x8xf32>
    %114 = arith.mulf %109, %113 : vector<8x8xf32>
    %115 = vector.extract_strided_slice %47 {offsets = [0, 16], sizes = [8, 8], strides = [1, 1]} : vector<8x32xf32> to vector<8x8xf32>
    %cst_56 = arith.constant dense<0.000000e+00> : vector<8x8xf32>
    %116 = tpu.matmul %114, %115, %cst_56 {dimension_numbers = #tpu.dot_dimension_numbers<[1], [0], [0], [1], [0, 0, 1, 1], [], []>} : vector<8x8xf32>, vector<8x8xf32>, vector<8x8xf32> -> vector<8x8xf32>
    %c2 = arith.constant 2 : index
    %c0_57 = arith.constant 0 : index
    %c0_58 = arith.constant 0 : index
    %117 = vector.load %arg13[%c2, %c0_57, %c0_58] : memref<4x8x32xf32, #tpu.memory_space<vmem>>, vector<1x8x32xf32>
    %118 = vector.shape_cast %117 : vector<1x8x32xf32> to vector<8x32xf32>
    %cst_59 = arith.constant dense<0.000000e+00> : vector<8x32xf32>
    %119 = tpu.matmul %116, %118, %cst_59 {dimension_numbers = #tpu.dot_dimension_numbers<[1], [0], [0], [1], [0, 0, 1, 1], [], []>} : vector<8x8xf32>, vector<8x32xf32>, vector<8x32xf32> -> vector<8x32xf32>
    %120 = arith.addf %99, %119 : vector<8x32xf32>
    %121 = vector.extract_strided_slice %49 {offsets = [0, 24], sizes = [8, 8], strides = [1, 1]} : vector<8x32xf32> to vector<8x8xf32>
    %122 = vector.extract_strided_slice %42 {offsets = [0, 24], sizes = [8, 8], strides = [1, 1]} : vector<8x32xf32> to vector<8x8xf32>
    "tpu.trace_start"() <{level = 10 : i32, message = "qd,kd->qk"}> : () -> ()
    %cst_60 = arith.constant dense<0.000000e+00> : vector<8x8xf32>
    %123 = tpu.matmul %121, %122, %cst_60 {dimension_numbers = #tpu.dot_dimension_numbers<[1], [1], [0], [0], [0, 0, 1, 0], [], []>} : vector<8x8xf32>, vector<8x8xf32>, vector<8x8xf32> -> vector<8x8xf32>
    "tpu.trace_stop"() : () -> ()
    %124 = vector.broadcast %56 : vector<1x8xf32> to vector<8x8xf32>
    %125 = arith.addf %123, %124 : vector<8x8xf32>
    %cst_61 = arith.constant dense<0xFF800000> : vector<8xf32>
    %126 = vector.multi_reduction <maximumf>, %125, %cst_61 [1] : vector<8x8xf32> to vector<8xf32>
    %127 = vector.shape_cast %126 : vector<8xf32> to vector<8x1xf32>
    %128 = vector.broadcast %127 : vector<8x1xf32> to vector<8x8xf32>
    %129 = arith.subf %125, %128 : vector<8x8xf32>
    %130 = math.exp %129 : vector<8x8xf32>
    %cst_62 = arith.constant dense<0.000000e+00> : vector<8xf32>
    %131 = vector.multi_reduction <add>, %130, %cst_62 [1] : vector<8x8xf32> to vector<8xf32>
    %132 = vector.shape_cast %131 : vector<8xf32> to vector<8x1xf32>
    %133 = tpu.reciprocal %132 : vector<8x1xf32> -> vector<8x1xf32>
    %134 = vector.broadcast %133 : vector<8x1xf32> to vector<8x8xf32>
    %135 = arith.mulf %130, %134 : vector<8x8xf32>
    %136 = vector.extract_strided_slice %47 {offsets = [0, 24], sizes = [8, 8], strides = [1, 1]} : vector<8x32xf32> to vector<8x8xf32>
    %cst_63 = arith.constant dense<0.000000e+00> : vector<8x8xf32>
    %137 = tpu.matmul %135, %136, %cst_63 {dimension_numbers = #tpu.dot_dimension_numbers<[1], [0], [0], [1], [0, 0, 1, 1], [], []>} : vector<8x8xf32>, vector<8x8xf32>, vector<8x8xf32> -> vector<8x8xf32>
    %c3 = arith.constant 3 : index
    %c0_64 = arith.constant 0 : index
    %c0_65 = arith.constant 0 : index
    %138 = vector.load %arg13[%c3, %c0_64, %c0_65] : memref<4x8x32xf32, #tpu.memory_space<vmem>>, vector<1x8x32xf32>
    %139 = vector.shape_cast %138 : vector<1x8x32xf32> to vector<8x32xf32>
    %cst_66 = arith.constant dense<0.000000e+00> : vector<8x32xf32>
    %140 = tpu.matmul %137, %139, %cst_66 {dimension_numbers = #tpu.dot_dimension_numbers<[1], [0], [0], [1], [0, 0, 1, 1], [], []>} : vector<8x8xf32>, vector<8x32xf32>, vector<8x32xf32> -> vector<8x32xf32>
    %141 = arith.addf %120, %140 : vector<8x32xf32>
    %142 = arith.addf %1, %141 : vector<8x32xf32>
    %c0_67 = arith.constant 0 : index
    %c0_68 = arith.constant 0 : index
    %143 = vector.load %arg14[%c0_67, %c0_68] : memref<1x32xf32, #tpu.memory_space<vmem>>, vector<1x32xf32>
    %144 = vector.broadcast %143 : vector<1x32xf32> to vector<8x32xf32>
    %145 = arith.addf %142, %144 : vector<8x32xf32>
    %c0_69 = arith.constant 0 : index
    %c0_70 = arith.constant 0 : index
    %146 = vector.load %arg15[%c0_69, %c0_70] : memref<1x32xf32, #tpu.memory_space<vmem>>, vector<1x32xf32>
    %c0_71 = arith.constant 0 : index
    %c0_72 = arith.constant 0 : index
    %147 = vector.load %arg16[%c0_71, %c0_72] : memref<1x32xf32, #tpu.memory_space<vmem>>, vector<1x32xf32>
    %cst_73 = arith.constant dense<0.000000e+00> : vector<8xf32>
    %148 = vector.multi_reduction <add>, %145, %cst_73 [1] : vector<8x32xf32> to vector<8xf32>
    %149 = vector.shape_cast %148 : vector<8xf32> to vector<8x1xf32>
    %cst_74 = arith.constant 3.200000e+01 : f32
    %150 = vector.broadcast %cst_74 : f32 to vector<8x1xf32>
    %151 = arith.divf %149, %150 : vector<8x1xf32>
    %152 = arith.mulf %145, %145 : vector<8x32xf32>
    %cst_75 = arith.constant dense<0.000000e+00> : vector<8xf32>
    %153 = vector.multi_reduction <add>, %152, %cst_75 [1] : vector<8x32xf32> to vector<8xf32>
    %154 = vector.shape_cast %153 : vector<8xf32> to vector<8x1xf32>
    %cst_76 = arith.constant 3.200000e+01 : f32
    %155 = vector.broadcast %cst_76 : f32 to vector<8x1xf32>
    %156 = arith.divf %154, %155 : vector<8x1xf32>
    %157 = arith.mulf %151, %151 : vector<8x1xf32>
    %158 = arith.subf %156, %157 : vector<8x1xf32>
    %cst_77 = arith.constant 0.000000e+00 : f32
    %159 = vector.broadcast %cst_77 : f32 to vector<8x1xf32>
    %160 = arith.maximumf %158, %159 : vector<8x1xf32>
    %cst_78 = arith.constant 1.03225803 : f32
    %161 = vector.broadcast %cst_78 : f32 to vector<8x1xf32>
    %162 = arith.mulf %160, %161 : vector<8x1xf32>
    %163 = math.sqrt %162 : vector<8x1xf32>
    %cst_79 = arith.constant 9.99999997E-7 : f32
    %164 = vector.broadcast %cst_79 : f32 to vector<8x1xf32>
    %165 = arith.addf %163, %164 : vector<8x1xf32>
    %166 = tpu.reciprocal %165 : vector<8x1xf32> -> vector<8x1xf32>
    %167 = vector.broadcast %151 : vector<8x1xf32> to vector<8x32xf32>
    %168 = arith.subf %145, %167 : vector<8x32xf32>
    %169 = vector.broadcast %166 : vector<8x1xf32> to vector<8x32xf32>
    %170 = arith.mulf %168, %169 : vector<8x32xf32>
    %171 = vector.broadcast %146 : vector<1x32xf32> to vector<8x32xf32>
    %172 = arith.mulf %170, %171 : vector<8x32xf32>
    %173 = vector.broadcast %147 : vector<1x32xf32> to vector<8x32xf32>
    %174 = arith.addf %172, %173 : vector<8x32xf32>
    %c0_80 = arith.constant 0 : index
    %c0_81 = arith.constant 0 : index
    %175 = vector.load %arg17[%c0_80, %c0_81] : memref<32x64xf32, #tpu.memory_space<vmem>>, vector<32x64xf32>
    %cst_82 = arith.constant dense<0.000000e+00> : vector<8x64xf32>
    %176 = tpu.matmul %174, %175, %cst_82 {dimension_numbers = #tpu.dot_dimension_numbers<[1], [0], [0], [1], [0, 0, 1, 1], [], []>} : vector<8x32xf32>, vector<32x64xf32>, vector<8x64xf32> -> vector<8x64xf32>
    %c0_83 = arith.constant 0 : index
    %c0_84 = arith.constant 0 : index
    %177 = vector.load %arg18[%c0_83, %c0_84] : memref<1x64xf32, #tpu.memory_space<vmem>>, vector<1x64xf32>
    %178 = vector.broadcast %177 : vector<1x64xf32> to vector<8x64xf32>
    %179 = arith.addf %176, %178 : vector<8x64xf32>
    %cst_85 = arith.constant 0.000000e+00 : f32
    %180 = vector.broadcast %cst_85 : f32 to vector<8x64xf32>
    %181 = arith.maximumf %179, %180 : vector<8x64xf32>
    %c0_86 = arith.constant 0 : index
    %c0_87 = arith.constant 0 : index
    %182 = vector.load %arg19[%c0_86, %c0_87] : memref<64x32xf32, #tpu.memory_space<vmem>>, vector<64x32xf32>
    %cst_88 = arith.constant dense<0.000000e+00> : vector<8x32xf32>
    %183 = tpu.matmul %181, %182, %cst_88 {dimension_numbers = #tpu.dot_dimension_numbers<[1], [0], [0], [1], [0, 0, 1, 1], [], []>} : vector<8x64xf32>, vector<64x32xf32>, vector<8x32xf32> -> vector<8x32xf32>
    %c0_89 = arith.constant 0 : index
    %c0_90 = arith.constant 0 : index
    %184 = vector.load %arg20[%c0_89, %c0_90] : memref<1x32xf32, #tpu.memory_space<vmem>>, vector<1x32xf32>
    %185 = vector.broadcast %184 : vector<1x32xf32> to vector<8x32xf32>
    %186 = arith.addf %183, %185 : vector<8x32xf32>
    %187 = arith.addf %145, %186 : vector<8x32xf32>
    %c0_91 = arith.constant 0 : index
    %c0_92 = arith.constant 0 : index
    %c0_93 = arith.constant 0 : index
    %188 = vector.load %arg21[%c0_91, %c0_92, %c0_93] : memref<1x8x32xf32, #tpu.memory_space<vmem>>, vector<1x8x32xf32>
    %189 = vector.shape_cast %188 : vector<1x8x32xf32> to vector<8x32xf32>
    %190 = vector.shape_cast %187 : vector<8x32xf32> to vector<1x8x32xf32>
    tpu.vector_store %arg21[%c0_91, %c0_92, %c0_93], %190 {strides = array<i32>} : memref<1x8x32xf32, #tpu.memory_space<vmem>>, vector<1x8x32xf32>,
    return
  }
  func.func @transform_0(%arg0: i32, %arg1: i32) -> (i32, i32, i32) {
    %c0_i32 = arith.constant 0 : i32
    %c0_i32_0 = arith.constant 0 : i32
    return %arg0, %arg1, %c0_i32 : i32, i32, i32
  }
  func.func @transform_1(%arg0: i32, %arg1: i32) -> (i32, i32, i32) {
    %c0_i32 = arith.constant 0 : i32
    %c0_i32_0 = arith.constant 0 : i32
    %c0_i32_1 = arith.constant 0 : i32
    return %arg0, %c0_i32, %c0_i32_0 : i32, i32, i32
  }
  func.func @transform_2(%arg0: i32, %arg1: i32) -> (i32, i32, i32) {
    %c0_i32 = arith.constant 0 : i32
    %c0_i32_0 = arith.constant 0 : i32
    %c0_i32_1 = arith.constant 0 : i32
    return %arg0, %c0_i32, %c0_i32_0 : i32, i32, i32
  }
  func.func @transform_3(%arg0: i32, %arg1: i32) -> (i32, i32) {
    %c0_i32 = arith.constant 0 : i32
    %c0_i32_0 = arith.constant 0 : i32
    %c0_i32_1 = arith.constant 0 : i32
    return %c0_i32, %c0_i32_0 : i32, i32
  }
  func.func @transform_4(%arg0: i32, %arg1: i32) -> (i32, i32) {
    %c0_i32 = arith.constant 0 : i32
    %c0_i32_0 = arith.constant 0 : i32
    %c0_i32_1 = arith.constant 0 : i32
    return %c0_i32, %c0_i32_0 : i32, i32
  }
  func.func @transform_5(%arg0: i32, %arg1: i32) -> (i32, i32) {
    %c0_i32 = arith.constant 0 : i32
    %c0_i32_0 = arith.constant 0 : i32
    %c0_i32_1 = arith.constant 0 : i32
    return %c0_i32, %c0_i32_0 : i32, i32
  }
  func.func @transform_6(%arg0: i32, %arg1: i32) -> (i32, i32) {
    %c0_i32 = arith.constant 0 : i32
    %c0_i32_0 = arith.constant 0 : i32
    %c0_i32_1 = arith.constant 0 : i32
    return %c0_i32, %c0_i32_0 : i32, i32
  }
  func.func @transform_7(%arg0: i32, %arg1: i32) -> (i32, i32) {
    %c0_i32 = arith.constant 0 : i32
    %c0_i32_0 = arith.constant 0 : i32
    %c0_i32_1 = arith.constant 0 : i32
    return %c0_i32, %c0_i32_0 : i32, i32
  }
  func.func @transform_8(%arg0: i32, %arg1: i32) -> (i32, i32) {
    %c0_i32 = arith.constant 0 : i32
    %c0_i32_0 = arith.constant 0 : i32
    %c0_i32_1 = arith.constant 0 : i32
    return %c0_i32, %c0_i32_0 : i32, i32
  }
  func.func @transform_9(%arg0: i32, %arg1: i32) -> (i32, i32) {
    %c0_i32 = arith.constant 0 : i32
    %c0_i32_0 = arith.constant 0 : i32
    %c0_i32_1 = arith.constant 0 : i32
    return %c0_i32, %c0_i32_0 : i32, i32
  }
  func.func @transform_10(%arg0: i32, %arg1: i32) -> (i32, i32) {
    %c0_i32 = arith.constant 0 : i32
    %c0_i32_0 = arith.constant 0 : i32
    %c0_i32_1 = arith.constant 0 : i32
    return %c0_i32, %c0_i32_0 : i32, i32
  }
  func.func @transform_11(%arg0: i32, %arg1: i32) -> (i32, i32, i32) {
    %c0_i32 = arith.constant 0 : i32
    %c0_i32_0 = arith.constant 0 : i32
    %c0_i32_1 = arith.constant 0 : i32
    %c0_i32_2 = arith.constant 0 : i32
    return %c0_i32, %c0_i32_0, %c0_i32_1 : i32, i32, i32
  }
  func.func @transform_12(%arg0: i32, %arg1: i32) -> (i32, i32) {
    %c0_i32 = arith.constant 0 : i32
    %c0_i32_0 = arith.constant 0 : i32
    %c0_i32_1 = arith.constant 0 : i32
    return %c0_i32, %c0_i32_0 : i32, i32
  }
  func.func @transform_13(%arg0: i32, %arg1: i32) -> (i32, i32) {
    %c0_i32 = arith.constant 0 : i32
    %c0_i32_0 = arith.constant 0 : i32
    %c0_i32_1 = arith.constant 0 : i32
    return %c0_i32, %c0_i32_0 : i32, i32
  }
  func.func @transform_14(%arg0: i32, %arg1: i32) -> (i32, i32) {
    %c0_i32 = arith.constant 0 : i32
    %c0_i32_0 = arith.constant 0 : i32
    %c0_i32_1 = arith.constant 0 : i32
    return %c0_i32, %c0_i32_0 : i32, i32
  }
  func.func @transform_15(%arg0: i32, %arg1: i32) -> (i32, i32) {
    %c0_i32 = arith.constant 0 : i32
    %c0_i32_0 = arith.constant 0 : i32
    %c0_i32_1 = arith.constant 0 : i32
    return %c0_i32, %c0_i32_0 : i32, i32
  }
  func.func @transform_16(%arg0: i32, %arg1: i32) -> (i32, i32) {
    %c0_i32 = arith.constant 0 : i32
    %c0_i32_0 = arith.constant 0 : i32
    %c0_i32_1 = arith.constant 0 : i32
    return %c0_i32, %c0_i32_0 : i32, i32
  }
  func.func @transform_17(%arg0: i32, %arg1: i32) -> (i32, i32) {
    %c0_i32 = arith.constant 0 : i32
    %c0_i32_0 = arith.constant 0 : i32
    %c0_i32_1 = arith.constant 0 : i32
    return %c0_i32, %c0_i32_0 : i32, i32
  }
  func.func @transform_18(%arg0: i32, %arg1: i32) -> (i32, i32) {
    %c0_i32 = arith.constant 0 : i32
    %c0_i32_0 = arith.constant 0 : i32
    %c0_i32_1 = arith.constant 0 : i32
    return %c0_i32, %c0_i32_0 : i32, i32
  }
  func.func @transform_19(%arg0: i32, %arg1: i32) -> (i32, i32, i32) {
    %c0_i32 = arith.constant 0 : i32
    %c0_i32_0 = arith.constant 0 : i32
    return %arg0, %arg1, %c0_i32 : i32, i32, i32
  }
}

</mosaic_0001>

<bundles_post_ra>
// kernel: tpu_custom_call.1
= control target key start
LH: loop header
LB: loop body
LE: loop exit
PB: predicated region body
PF: predicated region fallthrough
CT: control target
= control target key end

     0   :  { %s2490_s0 = inlined_call_operand.hbm [shape: f32[2,8,32], index: 0, kind: input, shape index: {}]   ;;  %s2491_s1 = inlined_call_operand.hbm [shape: f32[2,8,32], index: 1, kind: input, shape index: {}]   ;;  %s2492_s2 = inlined_call_operand.hbm [shape: f32[2,1,8], index: 2, kind: input, shape index: {}]   ;;  %s2493_s3 = inlined_call_operand.vmem [shape: f32[1,32], index: 3, kind: input, shape index: {}]   ;;  %s2494_s4 = inlined_call_operand.vmem [shape: f32[1,32], index: 4, kind: input, shape index: {}]   ;;  %s2495_s5 = inlined_call_operand.vmem [shape: f32[32,32], index: 5, kind: input, shape index: {}]   ;;  %s2496_s6 = inlined_call_operand.vmem [shape: f32[1,32], index: 6, kind: input, shape index: {}]   ;;  %s2497_s7 = inlined_call_operand.vmem [shape: f32[32,32], index: 7, kind: input, shape index: {}]   ;;  %s2498_s8 = inlined_call_operand.vmem [shape: f32[1,32], index: 8, kind: input, shape index: {}]   ;;  %s2499_s9 = inlined_call_operand.vmem [shape: f32[32,32], index: 9, kind: input, shape index: {}]   ;;  %s2500_s10 = inlined_call_operand.vmem [shape: f32[1,32], index: 10, kind: input, shape index: {}]   ;;  %s2501_s11 = inlined_call_operand.hbm [shape: f32[4,8,32], index: 11, kind: input, shape index: {}]   ;;  %s2502_s12 = inlined_call_operand.vmem [shape: f32[1,32], index: 12, kind: input, shape index: {}]   ;;  %s2503_s13 = inlined_call_operand.vmem [shape: f32[1,32], index: 13, kind: input, shape index: {}]   ;;  %s2504_s14 = inlined_call_operand.vmem [shape: f32[1,32], index: 14, kind: input, shape index: {}]   ;;  %s2505_s15 = inlined_call_operand.hbm [shape: f32[32,64], index: 15, kind: input, shape index: {}]   ;;  %s2506_s16 = inlined_call_operand.vmem [shape: f32[1,64], index: 16, kind: input, shape index: {}]   ;;  %s2507_s17 = inlined_call_operand.vmem [shape: f32[64,32], index: 17, kind: input, shape index: {}]   ;;  %s2508_s18 = inlined_call_operand.vmem [shape: f32[1,32], index: 18, kind: input, shape index: {}]   ;;  %s2509_s19 = inlined_call_operand.hbm [shape: f32[2,8,32], index: 19, kind: output, shape index: {}]  }
   0x1   :  { %2523 = sst [smem:[#allocation24_spill]] %s2490_s0 }
   0x2   :  { %2524 = sst [smem:[#allocation25_spill]] %s2491_s1 }
   0x3   :  { %2525 = sst [smem:[#allocation26_spill]] %s2492_s2 }
   0x4   :  { %2526 = sst [smem:[#allocation27_spill]] %s2493_s3 }
   0x5   :  { %2527 = sst [smem:[#allocation28_spill]] %s2494_s4 }
   0x6   :  { %2528 = sst [smem:[#allocation29_spill]] %s2496_s6 }
   0x7   :  { %2529 = sst [smem:[#allocation30_spill]] %s2498_s8 }
   0x8   :  { %2530 = sst [smem:[#allocation31_spill]] %s2499_s9 }
   0x9   :  { %2531 = sst [smem:[#allocation32_spill]] %s2500_s10 }
   0xa   :  { %2532 = sst [smem:[#allocation33_spill]] %s2501_s11 }
   0xb   :  { %2533 = sst [smem:[#allocation34_spill]] %s2502_s12 }
   0xc   :  { %2534 = sst [smem:[#allocation35_spill]] %s2503_s13 }
   0xd   :  { %2535 = sst [smem:[#allocation36_spill]] %s2504_s14 }
   0xe   :  { %2536 = sst [smem:[#allocation37_spill]] %s2505_s15 }
   0xf   :  { %2537 = sst [smem:[#allocation38_spill]] %s2506_s16 }
  0x10   :  { %2538 = sst [smem:[#allocation39_spill]] %s2507_s17 }
  0x11   :  { %2539 = sst [smem:[#allocation40_spill]] %s2508_s18 }
  0x12   :  { %2540 = sst [smem:[#allocation41_spill]] %s2509_s19 }
  0x13   :  { %24 = vsyncpa [#allocation3], 0 }
  0x14   :  { %26 = vsyncpa [#allocation3 + $0x1], 0 }
  0x15   :  { %27 = vsyncpa [#allocation6], 0 }
  0x16   :  { %29 = vsyncpa [#allocation6 + $0x1], 0 }
  0x17   :  { %30 = vsyncpa [#allocation9], 0 }
  0x18   :  { %31 = vsyncpa [#allocation4], 0 }
  0x19   :  { %33 = vsyncpa [#allocation4 + $0x1], 0  ;;  %s2118_s0 = smov 0   ;;  %s2120_s30 = smov 0  }
  0x1a   :  { %s2122_s20 = smov 0   ;;  %s2124_s21 = smov 0  }
  0x1b   :  { %s2126_s1 = smov 0   ;;  %s2128_s22 = smov 0  }
  0x1c LB: > { %2541 = sst [smem:[#allocation16_spill]] %s1987_s0  ;;  %s2149_s2 = sadd.s32 4294967295, %s2007_s22   ;;  %s2007_s22 = sphi %s2128_s22, %s39_s22   ;;  %s2003_s1 = sphi %s2126_s1, %s2589_s1   ;;  %s1999_s21 = sphi %s2124_s21, %s2588_s21   ;;  %s1995_s20 = sphi %s2122_s20, %s2584_s20   ;;  %s1991_s30 = sphi %s2120_s30, %s2587_s30   ;;  %s1987_s0 = sphi %s2118_s0, %s2586_s0  }
  0x1d   : > { %2542 = sst [smem:[#allocation17_spill]] %s1995_s20  ;;  %p1592_p0 = scmp.ge.s32.totalorder %s2007_s22, 1 }
  0x1e   : > { %2543 = sst [smem:[#allocation18_spill]] %s1999_s21  ;;  %p74_p1 = scmp.eq.s32.totalorder %s2149_s2, 0 }
  0x1f   : > { %2544 = sst [smem:[#allocation19_spill]] %s2007_s22  ;;  %p500_p2 = scmp.lt.s32.totalorder %s2007_s22, 3 }
  0x20   : > { %s2545_s11 = sld [smem:[#allocation33_spill]]  ;;  %s2009_s26 = smov [#allocation8]  }
  0x21   : > { %p2157_p3 = pnand %p1592_p0, %p500_p2  ;;  %s537_s27 = sshll.u32 %s2009_s26, 4  ;;  %s538_s27 = int_to_ptr.vmem [resolvable:$true] %s537_s27 }
  0x22   : > { %s2511_s29 = smov 128   ;;  %s2512_s23 = smov 8  }
  0x23   : > { %p1647_p4 = pneg %p2157_p3  ;;  %s1591_s24 = sadd.s32 4294967294, %s2007_s22  }
  0x24   : > { %s51_s26 = sadd.s32 1, %s2003_s1  ;;  %p67_p8 = scmp.ne.s32.totalorder %s1995_s20, %s1991_s30 }
  0x25   : > { %p2165_p5 = pnand %p1647_p4, %p74_p1  ;;  %p53_p7 = scmp.ge.s32.totalorder %s51_s26, 2 }
  0x26   : > { %s535_s25 = sshll.u32 %s2545_s11, 4  ;;  %s60_s11 = sadd.s32 1, %s1995_s20  ;;  %s536_s25 = int_to_ptr.hbm [resolvable:$true] %s535_s25 }
  0x27   : > { %1650 = dma.hbm_to_vmem [thread:$0]  (!%p2165_p5), %s536_s25, 512, %s538_s27, [#allocation9], %s2511_s29, %s2511_s29, %s2512_s23  }
  0x28   : > { %p68_p9 = scmp.eq.s32.totalorder %s2007_s22, 0  ;;  %p73_p10 = scmp.ne.s32.totalorder %s1991_s30, %s1987_s0 }
  0x29   : > { %s2591_s26 = smov (%p53_p7, %s51_s26), 0  ;;  %p487_p13 = scmp.eq.s32.totalorder %s2149_s2, 1 }
  0x2a   : > { %2548 = sst [smem:[#allocation20_spill]] %s2591_s26  ;;  %p2185_p11 = por %p68_p9, %p67_p8 }
  0x2b   : > { %p2191_p12 = por %p74_p1, %p73_p10  ;;  %s55_s27 = ssub.s32 %s2003_s1, %s2591_s26 }
  0x2c   : > { %p58_p0 = scmp.eq.s32.totalorder %s55_s27, 0  ;;  %p493_p2 = scmp.eq.s32.totalorder %s1591_s24, 1 }
  0x2d   : > { %p2198_p4 = por %p487_p13, %p67_p8  ;;  %p1670_p7 = scmp.lt.s32.totalorder %s2007_s22, 2 }
  0x2e   : > { %s2204_s23 = scalar_select %p58_p0, %s1995_s20, %s60_s11  }
  0x2f   : > { %s2551_s29 = scalar_select %p2198_p4, 1, 0 }
  0x30   : > { %2553 = sst [smem:[#allocation22_spill]] %s2204_s23  ;;  %p2206_p9 = por %p493_p2, %p73_p10 }
  0x31   : > { %2552 = sst [smem:[#allocation21_spill]] %s2551_s29  ;;  %s2211_s18 = sand.u32 1, %s1995_s20  }
  0x32   : > { %s2554_s0 = scalar_select %p2206_p9, 1, 0 }
  0x33   : > { %s1596_s16 = sshll.u32 %s2211_s18, 3  ;;  %s1597_s21 = sshll.u32 %s2003_s1, 3 }
  0x34   : > { %2555 = sst [smem:[#allocation23_spill]] %s2554_s0  ;;  %p2217_p6 = pnand %p1670_p7, %p2185_p11 }
  0x35   : > { %s603_s27 = sand.u32 1, %s2007_s22   ;;  %s2557_s23 = sld [smem:[#allocation25_spill]] }
  0x36   : > { %s607_s13 = scalar_lea.vmem [#allocation5], %s1596_s16  ;;  %s604_s20 = scalar_lea.sflag [#allocation6], %s603_s27 }
  0x37   : > { %s615_s0 = sshll.u32 %s607_s13, 4  ;;  %s2558_s15 = sld [smem:[#allocation37_spill]]  ;;  %s616_s0 = int_to_ptr.vmem [resolvable:$true] %s615_s0 }
  0x38   : > { %s2012_s22 = smov [#allocation10]   ;;  %s2560_s13 = smov 128  }
  0x39   : > { %s560_s26 = sshll.u32 %s2012_s22, 4  ;;  %s2561_s11 = sld [smem:[#allocation24_spill]]  ;;  %s561_s26 = int_to_ptr.vmem [resolvable:$true] %s560_s26 }
  0x3a   : > { %s584_s17 = scalar_lea.sflag [#allocation3], %s2211_s18  ;;  %s2562_s28 = sld [smem:[#allocation26_spill]] }
  0x3b   : > { %s611_s29 = scalar_lea.hbm %s2557_s23, %s1597_s21  ;;  %s625_s4 = scalar_lea.vmem [#allocation7], %s2211_s18 }
  0x3c   : > { %s613_s14 = sshll.u32 %s611_s29, 4  ;;  %s2559_s29 = smov 8   ;;  %s614_s14 = int_to_ptr.hbm [resolvable:$true] %s613_s14 }
  0x3d   : > { %1660 = dma.hbm_to_vmem [thread:$0]  (!%p2217_p6), %s614_s14, 128, %s616_s0, %s604_s20  }
  0x3e   : > { %s558_s12 = sshll.u32 %s2558_s15, 4  ;;  %s587_s0 = scalar_lea.vmem [#allocation2], %s1596_s16  ;;  %s559_s12 = int_to_ptr.hbm [resolvable:$true] %s558_s12 }
  0x3f   : > { %1653 = dma.hbm_to_vmem [thread:$0]  (!%p2165_p5), %s559_s12, 512, %s561_s26, [#allocation9], %s2560_s13, %s2560_s13, %s2559_s29  }
  0x40   : > { %s592_s10 = scalar_lea.hbm %s2561_s11, %s1597_s21  ;;  %s596_s8 = sshll.u32 %s587_s0, 4  ;;  %s597_s8 = int_to_ptr.vmem [resolvable:$true] %s596_s8 }
  0x41   : > { %s594_s14 = sshll.u32 %s592_s10, 4  ;;  %s628_s15 = scalar_lea.hbm %s2562_s28, %s2003_s1  ;;  %s595_s14 = int_to_ptr.hbm [resolvable:$true] %s594_s14 }
  0x42   : > { %1657 = dma.hbm_to_vmem [thread:$0]  (!%p2217_p6), %s595_s14, 128, %s597_s8, %s584_s17  }
  0x43   : > { %s630_s6 = sshll.u32 %s628_s15, 4  ;;  %s632_s9 = sshll.u32 %s625_s4, 4  ;;  %s631_s6 = int_to_ptr.hbm [resolvable:$true] %s630_s6  ;;  %s633_s9 = int_to_ptr.vmem [resolvable:$true] %s632_s9 }
  0x44   : > { %1663 = dma.hbm_to_vmem [thread:$0]  (!%p2217_p6), %s631_s6, 16, %s633_s9, %s604_s20  }
  0x45   : > { %641 = sbr.rel (%p2157_p3) target bundleno = 2028 (0x7ec), region = 96  ;;  %s2251_s10 = sand.u32 (!%p2157_p3), 1, %s1991_s30  }
  0x46   : > { %s2254_s8 = sshll.u32 (!%p2157_p3), %s2251_s10, 3  ;;  %s644_s12 = scalar_lea.sflag (!%p2157_p3), [#allocation3], %s2251_s10 }
  0x47   : > { %s647_s15 = scalar_lea.vmem (!%p2157_p3), [#allocation2], %s2254_s8 }
  0x4a   : > { %1970 = dma.done.wait (%p2191_p12), %s644_s12, 128  }
  0x4b   : > { %1972 = vsyncadd (%p2191_p12), %s644_s12, 4294967168  ;;  %s653_s4 = sand.u32 1, %s2149_s2   ;;  %s657_s9 = scalar_lea.vmem [#allocation5], %s2254_s8 }
  0x4c   : > { %s654_s6 = scalar_lea.sflag [#allocation6], %s653_s4 }
  0x4d   : > { %1974 = dma.done.wait (%p2191_p12), %s654_s6, 144  }
  0x4e   : > { %1976 = vsyncadd (%p2191_p12), %s654_s6, 4294967152  ;;  %s666_s16 = scalar_lea.vmem [#allocation7], %s2251_s10 }
  0x4f   : > { %1978 = dma.done.wait (%p74_p1), [#allocation9], 1024  }
  0x50   : > { %1980 = vsyncadd (%p74_p1), [#allocation9], 4294966272  ;;  %vm745_vm0 = vcmask 261120   ;;  %v2273_v0 = vld [vmem:[%s657_s9] sm:$0xff]  ;;  %v2013_v4 = vmov 32.0   ;;  %s2563_s24 = sld [smem:[#allocation31_spill]] }
  0x51   : > { %v746_v1 = vsel %vm745_vm0, %v2273_v0, 0.0  ;;  %v757_v2 = vmul.f32 %v2273_v0, %v2273_v0  ;;  %1741 = vrcp.f32 %v2013_v4  ;;  %v806_v12 = vld [vmem:[%s2495_s5 + $0x18] sm:$0xff]  ;;  %v805_v15 = vld [vmem:[%s2495_s5 + $0x10] sm:$0xff]  ;;  %v804_v18 = vld [vmem:[%s2495_s5 + $0x8] sm:$0xff]  ;;  %s2564_s3 = sld [smem:[#allocation27_spill]]  ;;  %vm897_vm8 = vcmask 64512  }
  0x52   : > { %747 = vadd.xlane.f32.xlu0 %v746_v1  ;;  %v837_v13 = vld [vmem:[%s2497_s7 + $0x18] sm:$0xff]  ;;  %826 = vmatpush.msra.mxu0 %v806_v12  ;;  %v836_v16 = vld [vmem:[%s2497_s7 + $0x10] sm:$0xff]  ;;  %v835_v19 = vld [vmem:[%s2497_s7 + $0x8] sm:$0xff]  ;;  %s2565_s29 = sld [smem:[#allocation28_spill]]  ;;  %s2014_s17 = smov 112  }
  0x53   : > { %v758_v3 = vsel %vm745_vm0, %v757_v2, 0.0  ;;  %854 = vmatpush.msra.mxu1 %v837_v13  ;;  %v803_v22 = vld [vmem:[%s2495_s5] sm:$0xff]  ;;  %s2566_s27 = sld [smem:[#allocation29_spill]]  ;;  %s2015_s22 = smov 120  }
  0x54   : > { %827 = vmatpush.msra.mxu0 %v805_v15  ;;  %v834_v23 = vld [vmem:[%s2497_s7] sm:$0xff]  ;;  %s2567_s0 = sld [smem:[#allocation30_spill]]  ;;  %s2016_s4 = smov 104  }
  0x55   : > { %855 = vmatpush.msra.mxu1 %v836_v16  ;;  %s2568_s12 = sld [smem:[#allocation32_spill]] }
  0x56   : > { %v865_v14 = vld [vmem:[%s2563_s24 + $0x18] sm:$0xff]  ;;  %v864_v17 = vld [vmem:[%s2563_s24 + $0x10] sm:$0xff]  ;;  %v863_v21 = vld [vmem:[%s2563_s24 + $0x8] sm:$0xff]  ;;  %828 = vmatpush.msra.mxu0 %v804_v18  ;;  %s2569_s9 = sld [smem:[#allocation34_spill]] }
  0x57   : > { %v1742_v5 = vpop.eup %1741  ;;  %882 = vmatpush.msra.mxu2 %v865_v14  ;;  %856 = vmatpush.msra.mxu1 %v835_v19  ;;  %v862_v24 = vld [vmem:[%s2563_s24] sm:$0xff]  ;;  %s2570_s20 = sld [smem:[#allocation39_spill]] }
  0x58   : > { %v750_v6 = vmul.f32 32.0, %v1742_v5  ;;  %vm754_vm1 = vweird.f32 %v1742_v5  ;;  %829 = vmatpush.msra.mxu0 %v803_v22  ;;  %v1731_v52 = vld [vmem:[%s2564_s3] ss:$0 sm:$0xff]  ;;  %s2573_s19 = sld [smem:[#allocation36_spill]] }
  0x59   : > { %883 = vmatpush.msra.mxu2 %v864_v17  ;;  %857 = vmatpush.msra.mxu1 %v834_v23  ;;  %v1732_v55 = vld [vmem:[%s2565_s29] ss:$0 sm:$0xff]  ;;  %s2574_s28 = sld [smem:[#allocation18_spill]] }
  0x5a   : > { %759 = vadd.xlane.f32.xlu0 %v758_v3  ;;  %v751_v7 = vsub.f32 1.0, %v750_v6  ;;  %v1733_v58 = vld [vmem:[%s2566_s27] ss:$0 sm:$0xff]  ;;  %s2575_s21 = sld [smem:[#allocation38_spill]] }
  0x5b   : > { %884 = vmatpush.msra.mxu2 %v863_v21  ;;  %v1734_v59 = vld [vmem:[%s2567_s0] ss:$0 sm:$0xff]  ;;  %s2572_s0 = sld [smem:[#allocation35_spill]] }
  0x5c   : > { %v752_v8 = vmul.f32 %v1742_v5, %v751_v7  ;;  %v1735_v1 = vld [vmem:[%s2568_s12] ss:$0 sm:$0xff]  ;;  %s2576_s29 = sld [smem:[#allocation40_spill]] }
  0x5d   : > { %885 = vmatpush.msra.mxu2 %v862_v24  ;;  %s2571_s2 = smov %s2570_s20  ;;  %s2577_s27 = sld [smem:[#allocation41_spill]] }
  0x5e   : > { %v753_v9 = vadd.f32 %v1742_v5, %v752_v8  ;;  %v891_v8 = vld [vmem:[%s666_s16] sm:$0x1] }
  0x5f   : > { %vm892_vm9 = vcmp.gt.f32.partialorder %v891_v8, 0.0  ;;  %s1628_s3 = sshll.u32 %s2574_s28, 3 }
  0x60   : > { %v2280_v11 = vsel %vm754_vm1, %v1742_v5, %v753_v9  ;;  %v2017_v9 = vmov -1e+09  }
  0x63   : > { %s1447_s14 = scalar_lea.hbm %s2577_s27, %s1628_s3 }
  0xc5   : > { %v748_v10 = vpop.xlane.xlu0 %747 }
  0xc6   : > { %v756_v20 = vmul.f32 %v2280_v11, %v748_v10  ;;  %v893_v10 = vsel %vm892_vm9, 0.0, %v2017_v9 }
  0xc7   : > { %v2355_v12 = vperm.slane %v893_v10, 0 }
  0xc8   : > { %v762_v26 = vmul.f32 %v756_v20, %v756_v20  ;;  %v793_v50 = vsub.f32 %v2273_v0, %v756_v20 }
  0xcd   : > { %v760_v25 = vpop.xlane.xlu0 %759 }
  0xce   : > { %v761_v27 = vmul.f32 %v760_v25, %v2280_v11 }
  0xd0   : > { %v763_v28 = vsub.f32 %v761_v27, %v762_v26 }
  0xd2   : > { %v764_v29 = vmax.f32 %v763_v28, 0.0 }
  0xd4   : > { %v765_v30 = vmul.f32 1.032258, %v764_v29 }
  0xd6   : > { %1743 = vrsqrt.f32 %v765_v30  ;;  %vm773_vm2 = vcmp.eq.f32.partialorder %v765_v30, inf  ;;  %v776_v38 = vand.u32 2147483648, %v765_v30  ;;  %vm775_vm3 = vcmp.eq.f32.partialorder %v765_v30, 0.0 }
  0xdc   : > { %v1744_v31 = vpop.eup %1743 }
  0xdd   : > { %v767_v32 = vmul.f32 %v1744_v31, %v765_v30 }
  0xdf   : > { %v768_v33 = vmul.f32 %v1744_v31, %v767_v32 }
  0xe1   : > { %v769_v34 = vmul.f32 0.5, %v768_v33 }
  0xe3   : > { %v770_v35 = vsub.f32 1.5, %v769_v34 }
  0xe5   : > { %v771_v36 = vmul.f32 %v1744_v31, %v770_v35  ;;  %v971_v35 = vld [vmem:[#allocation8] sm:$0xff] }
  0xe7   : > { %v772_v37 = vmul.f32 %v771_v36, %v765_v30 }
  0xe9   : > { %v774_v39 = vsel %vm773_vm2, %v765_v30, %v772_v37 }
  0xea   : > { %v777_v40 = vsel %vm775_vm3, %v776_v38, %v774_v39 }
  0xeb   : > { %v778_v41 = vadd.f32 1e-06, %v777_v40 }
  0xed   : > { %1745 = vrcp.f32 %v778_v41  ;;  %v790_v45 = vand.u32 2147483648, %v778_v41  ;;  %v788_v47 = vand.u32 2147483647, %v778_v41  ;;  %vm784_vm5 = vweird.f32 %v778_v41 }
  0xef   : > { %v791_v49 = vor.u32 1.1754944e-38, %v790_v45  ;;  %vm789_vm7 = vcmp.eq.f32.partialorder %v788_v47, 8.507059e+37 }
  0xf3   : > { %v1746_v42 = vpop.eup %1745 }
  0xf4   : > { %v780_v43 = vmul.f32 %v1746_v42, %v778_v41  ;;  %vm785_vm4 = vweird.f32 %v1746_v42 }
  0xf5   : > { %vm786_vm6 = vmor %vm784_vm5, %vm785_vm4 }
  0xf6   : > { %v781_v44 = vsub.f32 1.0, %v780_v43 }
  0xf8   : > { %v782_v46 = vmul.f32 %v1746_v42, %v781_v44 }
  0xfa   : > { %v783_v48 = vadd.f32 %v1746_v42, %v782_v46 }
  0xfc   : > { %v787_v51 = vsel %vm786_vm6, %v1746_v42, %v783_v48 }
  0xfd   : > { %v792_v53 = vsel %vm789_vm7, %v791_v49, %v787_v51 }
  0xfe   : > { %v794_v54 = vmul.f32 %v793_v50, %v792_v53 }
 0x100   : > { %v798_v56 = vmul.f32 %v1731_v52, %v794_v54 }
 0x102   : > { %v802_v57 = vadd.f32 %v1732_v55, %v798_v56 }
 0x104   : > { %1606 = vmatmul.msk.f32.vlgmr.msra.gmra.mxu0 %vm745_vm0, %v802_v57  ;;  %1607 = vmatmul.msk.f32.vlgmr.msra.gmra.mxu1 %vm745_vm0, %v802_v57 }
 0x105   : > { %1608 = vmatmul.msk.f32.vlgmr.msra.gmra.mxu2 %vm745_vm0, %v802_v57 }
 0x181   : > { %v831_v60 = vpop.f32.mrf.mxu0  ;;  %v859_v61 = vpop.f32.mrf.mxu1 }
 0x182   : > { %v832_v62 = vadd.f32 %v1733_v58, %v831_v60  ;;  %v860_v63 = vadd.f32 %v1734_v59, %v859_v61 }
 0x184   : > { %v890_v0 = vmul.f32 0.35355338, %v832_v62  ;;  %1101 = vrot.lane.b32.xlu0 %v860_v63, %s2014_s17  ;;  %974 = vrot.lane.b32.xlu2 %v860_v63, %s2015_s22 }
 0x185   : > { %1609 = vmatpush.xpose.msk.msrb.mxu0 %vm897_vm8, %v860_v63 }
 0x188   : > { %v887_v2 = vpop.f32.mrf.mxu2  ;;  %1610 = vmatmul.msk.f32.vlgmr.msrb.gmra.mxu0 %vm897_vm8, %v890_v0 }
 0x189   : > { %v2343_v3 = vadd.f32 %v1735_v1, %v887_v2 }
 0x18b   : > { %966 = vmatpush.msra.mxu3 %v2343_v3 }
 0x18c   : > { %972 = vrot.lane.b32.xlu2 %v890_v0, %s2015_s22 }
 0x18d   : > { %1094 = vmatpush.msrb.mxu3 %v971_v35 }
 0x194   : > { %1099 = vrot.lane.b32.xlu2 %v890_v0, %s2014_s17 }
 0x19c   : > { %1203 = vrot.lane.b32.xlu2 %v890_v0, %s2016_s4 }
 0x1de   : > { %v975_v4 = vpop.permute.xlu2 %974 }
 0x1df   : > { %1612 = vmatpush.xpose.msk.msra.mxu0 %vm897_vm8, %v975_v4 }
 0x1e6   : > { %v973_v5 = vpop.permute.xlu2 %972 }
 0x1e7   : > { %1613 = vmatmul.msk.f32.vlgmr.msra.gmra.mxu0 %vm897_vm8, %v973_v5 }
 0x1ee   : > { %v1100_v7 = vpop.permute.xlu2 %1099 }
 0x1f6   : > { %v1102_v6 = vpop.permute.xlu0 %1101  ;;  %v1204_v27 = vpop.permute.xlu2 %1203 }
 0x1f7   : > { %1617 = vmatpush.xpose.msk.msrb.mxu0 %vm897_vm8, %v1102_v6 }
 0x1fa   : > { %1618 = vmatmul.msk.f32.vlgmr.msrb.gmra.mxu0 %vm897_vm8, %v1100_v7 }
 0x205   : > { %v921_v13 = vpop.f32.mrf.mxu0 }
 0x206   : > { %v922_v14 = vadd.f32 %v921_v13, %v2355_v12 }
 0x208   : > { %v924_v15 = vsel %vm897_vm8, %v922_v14, -inf }
 0x209   : > { %925 = vmax.xlane.f32.xlu1 %v924_v15 }
 0x264   : > { %v997_v16 = vpop.f32.mrf.mxu0 }
 0x265   : > { %v998_v17 = vadd.f32 %v997_v16, %v2355_v12 }
 0x267   : > { %v1000_v18 = vsel %vm897_vm8, %v998_v17, -inf }
 0x268   : > { %1001 = vmax.xlane.f32.xlu2 %v1000_v18 }
 0x277   : > { %v1124_v19 = vpop.f32.mrf.mxu0 }
 0x278   : > { %v1125_v20 = vadd.f32 %v1124_v19, %v2355_v12 }
 0x27a   : > { %v1127_v21 = vsel %vm897_vm8, %v1125_v20, -inf }
 0x27b   : > { %1128 = vmax.xlane.f32.xlu0 %v1127_v21 }
 0x27c   : > { %v926_v22 = vpop.xlane.xlu1 %925 }
 0x27d   : > { %v927_v23 = vsub.f32 %v922_v14, %v926_v22 }
 0x27f   : > { %v928_v24 = vmul.f32 1.442695, %v927_v23 }
 0x281   : > { %1747 = vpow2.f32 %v928_v24 }
 0x287   : > { %v1748_v25 = vpop.eup %1747 }
 0x288   : > { %v930_v26 = vsel %vm897_vm8, %v1748_v25, 0.0 }
 0x289   : > { %931 = vadd.xlane.f32.xlu1 %v930_v26  ;;  %v1052_v26 = vld [vmem:[#allocation8 + $0x8] sm:$0xff] }
 0x28a   : > { %1071 = vmatpush.msrb.mxu2 %v1052_v26 }
 0x2a2   : > { %1205 = vrot.lane.b32.xlu1 %v860_v63, %s2016_s4 }
 0x2db   : > { %v1002_v28 = vpop.xlane.xlu2 %1001 }
 0x2dc   : > { %v1003_v29 = vsub.f32 %v998_v17, %v1002_v28 }
 0x2de   : > { %v1004_v30 = vmul.f32 1.442695, %v1003_v29  ;;  %v1282_v29 = vld [vmem:[#allocation8 + $0x18] sm:$0xff] }
 0x2e0   : > { %1749 = vpow2.f32 %v1004_v30 }
 0x2e6   : > { %v2365_v31 = vpop.eup %1749 }
 0x2e7   : > { %v1006_v32 = vsel %vm897_vm8, %v2365_v31, 0.0 }
 0x2e8   : > { %1007 = vadd.xlane.f32.xlu2 %v1006_v32 }
 0x2ee   : > { %v1129_v33 = vpop.xlane.xlu0 %1128 }
 0x2ef   : > { %v1130_v34 = vsub.f32 %v1125_v20, %v1129_v33 }
 0x2f1   : > { %v1131_v36 = vmul.f32 1.442695, %v1130_v34 }
 0x2f3   : > { %1751 = vpow2.f32 %v1131_v36 }
 0x2f9   : > { %v2369_v37 = vpop.eup %1751 }
 0x2fa   : > { %v1133_v38 = vsel %vm897_vm8, %v2369_v37, 0.0 }
 0x2fb   : > { %1134 = vadd.xlane.f32.xlu0 %v1133_v38 }
 0x2fc   : > { %v932_v39 = vpop.xlane.xlu1 %931 }
 0x2fd   : > { %1753 = vrcp.f32 %v932_v39  ;;  %v944_v43 = vand.u32 2147483648, %v932_v39  ;;  %v942_v45 = vand.u32 2147483647, %v932_v39  ;;  %vm938_vm11 = vweird.f32 %v932_v39 }
 0x2ff   : > { %v945_v47 = vor.u32 1.1754944e-38, %v944_v43  ;;  %vm943_vm13 = vcmp.eq.f32.partialorder %v942_v45, 8.507059e+37 }
 0x303   : > { %v1754_v40 = vpop.eup %1753 }
 0x304   : > { %v934_v41 = vmul.f32 %v1754_v40, %v932_v39  ;;  %vm939_vm10 = vweird.f32 %v1754_v40 }
 0x305   : > { %vm940_vm12 = vmor %vm938_vm11, %vm939_vm10 }
 0x306   : > { %v935_v42 = vsub.f32 1.0, %v934_v41 }
 0x308   : > { %v936_v44 = vmul.f32 %v1754_v40, %v935_v42 }
 0x30a   : > { %v937_v46 = vadd.f32 %v1754_v40, %v936_v44 }
 0x30c   : > { %v941_v48 = vsel %vm940_vm12, %v1754_v40, %v937_v46 }
 0x30d   : > { %v946_v49 = vsel %vm943_vm13, %v945_v47, %v941_v48  ;;  %v741_v48 = vld [vmem:[%s647_s15] sm:$0xff] }
 0x30e   : > { %v947_v50 = vmul.f32 %v1748_v25, %v946_v49 }
 0x30f   : > { %1151 = vrot.lane.b32.xlu0 %v2343_v3, %s2014_s17 }
 0x310   : > { %1611 = vmatmul.msk.f32.vlgmr.msra.gmra.mxu3 %vm897_vm8, %v947_v50 }
 0x314   : > { %v1206_v51 = vpop.permute.xlu1 %1205 }
 0x315   : > { %1621 = vmatpush.xpose.msk.msra.mxu3 %vm897_vm8, %v1206_v51  ;;  %v1736_v51 = vld [vmem:[%s2569_s9] ss:$0 sm:$0xff] }
 0x35b   : > { %v1008_v57 = vpop.xlane.xlu2 %1007 }
 0x35c   : > { %1755 = vrcp.f32 %v1008_v57  ;;  %v1020_v9 = vand.u32 2147483648, %v1008_v57  ;;  %vm1014_vm15 = vweird.f32 %v1008_v57  ;;  %v1018_v10 = vand.u32 2147483647, %v1008_v57 }
 0x35e   : > { %v1021_v14 = vor.u32 1.1754944e-38, %v1020_v9  ;;  %vm1019_vm2 = vcmp.eq.f32.partialorder %v1018_v10, 8.507059e+37 }
 0x362   : > { %v1756_v59 = vpop.eup %1755 }
 0x363   : > { %v1010_v62 = vmul.f32 %v1756_v59, %v1008_v57  ;;  %vm1015_vm14 = vweird.f32 %v1756_v59 }
 0x364   : > { %vm1016_vm1 = vmor %vm1014_vm15, %vm1015_vm14 }
 0x365   : > { %v1011_v0 = vsub.f32 1.0, %v1010_v62 }
 0x367   : > { %v1012_v2 = vmul.f32 %v1756_v59, %v1011_v0  ;;  %v1366_v0 = vld [vmem:[#allocation10 + $0x8] sm:$0xff] }
 0x369   : > { %v1013_v7 = vadd.f32 %v1756_v59, %v1012_v2  ;;  %v1365_v2 = vld [vmem:[#allocation10] sm:$0xff] }
 0x36b   : > { %v1017_v13 = vsel %vm1016_vm1, %v1756_v59, %v1013_v7 }
 0x36c   : > { %v1022_v15 = vsel %vm1019_vm2, %v1021_v14, %v1017_v13  ;;  %v1402_v14 = vld [vmem:[%s2571_s2 + $0x28] sm:$0xff]  ;;  %vm1409_vm2 = vcmask 523264  }
 0x36d   : > { %v1023_v20 = vmul.f32 %v2365_v31, %v1022_v15 }
 0x36e   : > { %v1135_v58 = vpop.xlane.xlu0 %1134 }
 0x36f   : > { %1757 = vrcp.f32 %v1135_v58  ;;  %v1147_v17 = vand.u32 2147483648, %v1135_v58  ;;  %vm1141_vm4 = vweird.f32 %v1135_v58  ;;  %v1145_v18 = vand.u32 2147483647, %v1135_v58 }
 0x371   : > { %v1148_v23 = vor.u32 1.1754944e-38, %v1147_v17  ;;  %vm1146_vm6 = vcmp.eq.f32.partialorder %v1145_v18, 8.507059e+37  ;;  %v1401_v17 = vld [vmem:[%s2571_s2 + $0x20] sm:$0xff] }
 0x375   : > { %v1758_v1 = vpop.eup %1757 }
 0x376   : > { %v1137_v4 = vmul.f32 %v1758_v1, %v1135_v58  ;;  %vm1142_vm3 = vweird.f32 %v1758_v1 }
 0x377   : > { %vm1143_vm5 = vmor %vm1141_vm4, %vm1142_vm3 }
 0x378   : > { %v1138_v8 = vsub.f32 1.0, %v1137_v4 }
 0x381   : > { %v1152_v22 = vpop.permute.xlu0 %1151 }
 0x393   : > { %v968_v52 = vpop.f32.mrf.mxu3 }
 0x394   : > { %1616 = vmatmul.msk.f32.vlgmr.msrb.gmra.mxu3 %vm897_vm8, %v968_v52 }
 0x39c   : > { %1622 = vmatmul.msk.f32.vlgmr.msra.gmra.mxu3 %vm897_vm8, %v1204_v27  ;;  %v1178_v27 = vld [vmem:[#allocation8 + $0x10] sm:$0xff] }
 0x39d   : > { %1197 = vmatpush.msra.mxu2 %v1178_v27 }
 0x417   : > { %v2379_v53 = vpop.f32.mrf.mxu3 }
 0x41f   : > { %v1228_v54 = vpop.f32.mrf.mxu3 }
 0x420   : > { %v1229_v55 = vadd.f32 %v1228_v54, %v2355_v12  ;;  %v1139_v12 = vmul.f32 %v1758_v1, %v1138_v8 }
 0x422   : > { %v1231_v56 = vsel %vm897_vm8, %v1229_v55, -inf  ;;  %v1140_v16 = vadd.f32 %v1758_v1, %v1139_v12  ;;  %v1404_v12 = vld [vmem:[%s2570_s20 + $0x38] sm:$0xff] }
 0x423   : > { %1232 = vmax.xlane.f32.xlu1 %v1231_v56  ;;  %1421 = vmatpush.msrb.mxu3 %v1404_v12 }
 0x424   : > { %v1144_v21 = vsel %vm1143_vm5, %v1758_v1, %v1140_v16 }
 0x425   : > { %v1149_v24 = vsel %vm1146_vm6, %v1148_v23, %v1144_v21 }
 0x426   : > { %v1150_v25 = vmul.f32 %v2369_v37, %v1149_v24 }
 0x43c   : > { %1025 = vrot.lane.b32.xlu1 %v2343_v3, %s2015_s22  ;;  %s1451_s22 = sshll.u32 %s1447_s14, 4  ;;  %s1452_s22 = int_to_ptr.hbm [resolvable:$true] %s1451_s22 }
 0x43d   : > { %s1931_s28 = sshra.s32 %s1452_s22, 4  ;;  %s1932_s28 = int_to_ptr.hbm [resolvable:$true] %s1931_s28 }
 0x43e   : > { %s1933_s12 = scalar_lea.hbm %s1932_s28, 8  ;;  %p1938_p6 = scmp.lt.s32.totalorder %s1932_s28, %s2577_s27 }
 0x43f   : > { %p1934_p1 = scmp.ne.s32.totalorder %s1932_s28, %s1933_s12 }
 0x441   : > { %p1935_p3 = pnand %p1934_p1, %p2198_p4 }
 0x443   : > { %p1936_p5 = pneg %p1935_p3 }
 0x496   : > { %v1233_v60 = vpop.xlane.xlu1 %1232 }
 0x497   : > { %v1234_v61 = vsub.f32 %v1229_v55, %v1233_v60  ;;  %v1368_v60 = vld [vmem:[#allocation10 + $0x18] sm:$0xff] }
 0x499   : > { %v1235_v63 = vmul.f32 1.442695, %v1234_v61  ;;  %v1367_v61 = vld [vmem:[#allocation10 + $0x10] sm:$0xff] }
 0x49b   : > { %1759 = vpow2.f32 %v1235_v63 }
 0x4a1   : > { %v1760_v5 = vpop.eup %1759 }
 0x4a2   : > { %v1237_v6 = vsel %vm897_vm8, %v1760_v5, 0.0 }
 0x4a3   : > { %1238 = vadd.xlane.f32.xlu2 %v1237_v6 }
 0x4ae   : > { %v1026_v19 = vpop.permute.xlu1 %1025 }
 0x4af   : > { %1046 = vmatpush.msrb.mxu1 %v1026_v19 }
 0x4b0   : > { %1614 = vmatmul.msk.f32.vlgmr.msrb.gmra.mxu1 %vm897_vm8, %v1023_v20  ;;  %v1400_v20 = vld [vmem:[%s2571_s2 + $0x18] sm:$0xff] }
 0x4b1   : > { %1172 = vmatpush.msra.mxu1 %v1152_v22 }
 0x4b3   : > { %1301 = vmatpush.msrb.mxu1 %v1282_v29 }
 0x4b8   : > { %1619 = vmatmul.msk.f32.vlgmr.msra.gmra.mxu1 %vm897_vm8, %v1150_v25 }
 0x4bb   : > { %1255 = vrot.lane.b32.xlu2 %v2343_v3, %s2016_s4 }
 0x516   : > { %v1239_v28 = vpop.xlane.xlu2 %1238 }
 0x517   : > { %1761 = vrcp.f32 %v1239_v28  ;;  %v1251_v34 = vand.u32 2147483648, %v1239_v28  ;;  %v1249_v36 = vand.u32 2147483647, %v1239_v28  ;;  %vm1245_vm9 = vweird.f32 %v1239_v28 }
 0x519   : > { %v1252_v3 = vor.u32 1.1754944e-38, %v1251_v34  ;;  %vm1250_vm11 = vcmp.eq.f32.partialorder %v1249_v36, 8.507059e+37 }
 0x51d   : > { %v1762_v30 = vpop.eup %1761 }
 0x51e   : > { %v1241_v31 = vmul.f32 %v1762_v30, %v1239_v28  ;;  %v1256_v32 = vpop.permute.xlu2 %1255  ;;  %vm1246_vm7 = vweird.f32 %v1762_v30 }
 0x51f   : > { %1276 = vmatpush.msra.mxu0 %v1256_v32  ;;  %vm1247_vm10 = vmor %vm1245_vm9, %vm1246_vm7  ;;  %v1737_v32 = vld [vmem:[%s2572_s0] ss:$0 sm:$0xff]  ;;  %s740_s0 = scalar_lea.vmem [#allocation11], %s2254_s8  ;;  %s1937_s8 = scalar_lea.hbm %s2577_s27, 16 }
 0x520   : > { %v1242_v33 = vsub.f32 1.0, %v1241_v31  ;;  %s1449_s17 = sshll.u32 %s740_s0, 4  ;;  %p1939_p8 = scmp.lt.s32.totalorder %s1937_s8, %s1933_s12  ;;  %s1450_s17 = int_to_ptr.vmem [resolvable:$true] %s1449_s17 }
 0x522   : > { %v1243_v35 = vmul.f32 %v1762_v30, %v1242_v33  ;;  %p1940_p10 = por %p1939_p8, %p1938_p6 }
 0x524   : > { %v1244_v37 = vadd.f32 %v1762_v30, %v1243_v35  ;;  %v1738_v35 = vld [vmem:[%s2573_s19] ss:$0 sm:$0xff]  ;;  %s1436_s19 = scalar_lea.sflag [#allocation4], %s2251_s10  ;;  %p1941_p11 = pnand %p1940_p10, %p1936_p5 }
 0x526   : > { %v1248_v38 = vsel %vm1247_vm10, %v1762_v30, %v1244_v37 }
 0x527   : > { %v1253_v39 = vsel %vm1250_vm11, %v1252_v3, %v1248_v38  ;;  %v1399_v3 = vld [vmem:[%s2571_s2 + $0x10] sm:$0xff]  ;;  %v1398_v38 = vld [vmem:[%s2571_s2 + $0x8] sm:$0xff] }
 0x528   : > { %v1254_v40 = vmul.f32 %v1760_v5, %v1253_v39  ;;  %v1397_v39 = vld [vmem:[%s2571_s2] sm:$0xff] }
 0x52a   : > { %1623 = vmatmul.msk.f32.vlgmr.msra.gmra.mxu0 %vm897_vm8, %v1254_v40  ;;  %v1739_v40 = vld [vmem:[%s2575_s21] ss:$0 sm:$0xff] }
 0x52d   : > { %v1048_v41 = vpop.f32.mrf.mxu1 }
 0x52e   : > { %1615 = vmatmul.msk.f32.vlgmr.msrb.gmra.mxu2 %vm897_vm8, %v1048_v41 }
 0x52f   : > { %1388 = vmatpush.msrb.mxu2 %v1368_v60 }
 0x531   : > { %1389 = vmatpush.msrb.mxu2 %v1367_v61 }
 0x533   : > { %1390 = vmatpush.msrb.mxu2 %v1366_v0 }
 0x535   : > { %v1174_v42 = vpop.f32.mrf.mxu1  ;;  %1391 = vmatpush.msrb.mxu2 %v1365_v2 }
 0x536   : > { %1620 = vmatmul.msk.f32.vlgmr.msra.gmra.mxu2 %vm897_vm8, %v1174_v42 }
 0x5a7   : > { %v1278_v43 = vpop.f32.mrf.mxu0 }
 0x5a8   : > { %1624 = vmatmul.msk.f32.vlgmr.msrb.gmra.mxu1 %vm897_vm8, %v1278_v43 }
 0x5b1   : > { %v1073_v44 = vpop.f32.mrf.mxu2 }
 0x5b2   : > { %v1097_v46 = vadd.f32 %v2379_v53, %v1073_v44  ;;  %v1740_v44 = vld [vmem:[%s2576_s29] ss:$0 sm:$0xff] }
 0x5b9   : > { %v1199_v45 = vpop.f32.mrf.mxu2 }
 0x5ba   : > { %v1202_v47 = vadd.f32 %v1199_v45, %v1097_v46 }
 0x625   : > { %v1303_v49 = vpop.f32.mrf.mxu1 }
 0x626   : > { %v1306_v50 = vadd.f32 %v1303_v49, %v1202_v47 }
 0x628   : > { %v1307_v52 = vadd.f32 %v1306_v50, %v741_v48 }
 0x62a   : > { %v2402_v54 = vadd.f32 %v1736_v51, %v1307_v52 }
 0x62c   : > { %v1315_v55 = vsel %vm745_vm0, %v2402_v54, 0.0  ;;  %v1319_v56 = vmul.f32 %v2402_v54, %v2402_v54 }
 0x62d   : > { %1316 = vadd.xlane.f32.xlu0 %v1315_v55 }
 0x62e   : > { %v1320_v53 = vsel %vm745_vm0, %v1319_v56, 0.0 }
 0x62f   : > { %1321 = vadd.xlane.f32.xlu1 %v1320_v53 }
 0x6a0   : > { %v1317_v57 = vpop.xlane.xlu0 %1316 }
 0x6a1   : > { %v1318_v58 = vmul.f32 %v1317_v57, %v2280_v11 }
 0x6a2   : > { %v1322_v59 = vpop.xlane.xlu1 %1321 }
 0x6a3   : > { %v1324_v62 = vmul.f32 %v1318_v58, %v1318_v58  ;;  %v1323_v63 = vmul.f32 %v1322_v59, %v2280_v11  ;;  %v1403_v11 = vld [vmem:[%s2571_s2 + $0x30] sm:$0xff]  ;;  %v1355_v30 = vsub.f32 %v2402_v54, %v1318_v58 }
 0x6a4   : > { %1422 = vmatpush.msrb.mxu3 %v1403_v11 }
 0x6a5   : > { %v1325_v1 = vsub.f32 %v1323_v63, %v1324_v62 }
 0x6a6   : > { %1423 = vmatpush.msrb.mxu3 %v1402_v14 }
 0x6a7   : > { %v1326_v4 = vmax.f32 %v1325_v1, 0.0 }
 0x6a8   : > { %1424 = vmatpush.msrb.mxu3 %v1401_v17 }
 0x6a9   : > { %v1327_v5 = vmul.f32 1.032258, %v1326_v4 }
 0x6aa   : > { %1425 = vmatpush.msrb.mxu3 %v1400_v20 }
 0x6ab   : > { %1763 = vrsqrt.f32 %v1327_v5  ;;  %vm1335_vm8 = vcmp.eq.f32.partialorder %v1327_v5, inf  ;;  %v1338_v16 = vand.u32 2147483648, %v1327_v5  ;;  %vm1337_vm12 = vcmp.eq.f32.partialorder %v1327_v5, 0.0 }
 0x6ac   : > { %1426 = vmatpush.msrb.mxu3 %v1399_v3 }
 0x6ae   : > { %1427 = vmatpush.msrb.mxu3 %v1398_v38 }
 0x6b0   : > { %1428 = vmatpush.msrb.mxu3 %v1397_v39 }
 0x6b1   : > { %v1764_v6 = vpop.eup %1763 }
 0x6b2   : > { %v1329_v7 = vmul.f32 %v1764_v6, %v1327_v5 }
 0x6b4   : > { %v1330_v8 = vmul.f32 %v1764_v6, %v1329_v7 }
 0x6b6   : > { %v1331_v9 = vmul.f32 0.5, %v1330_v8 }
 0x6b8   : > { %v1332_v10 = vsub.f32 1.5, %v1331_v9 }
 0x6ba   : > { %v1333_v13 = vmul.f32 %v1764_v6, %v1332_v10 }
 0x6bc   : > { %v1334_v15 = vmul.f32 %v1333_v13, %v1327_v5 }
 0x6be   : > { %v1336_v18 = vsel %vm1335_vm8, %v1327_v5, %v1334_v15 }
 0x6bf   : > { %v1339_v19 = vsel %vm1337_vm12, %v1338_v16, %v1336_v18 }
 0x6c0   : > { %v1340_v21 = vadd.f32 1e-06, %v1339_v19 }
 0x6c2   : > { %1765 = vrcp.f32 %v1340_v21  ;;  %v1352_v25 = vand.u32 2147483648, %v1340_v21  ;;  %v1350_v27 = vand.u32 2147483647, %v1340_v21  ;;  %vm1346_vm14 = vweird.f32 %v1340_v21 }
 0x6c4   : > { %v1353_v29 = vor.u32 1.1754944e-38, %v1352_v25  ;;  %vm1351_vm1 = vcmp.eq.f32.partialorder %v1350_v27, 8.507059e+37 }
 0x6c8   : > { %v1766_v22 = vpop.eup %1765 }
 0x6c9   : > { %v1342_v23 = vmul.f32 %v1766_v22, %v1340_v21  ;;  %vm1347_vm13 = vweird.f32 %v1766_v22 }
 0x6ca   : > { %vm1348_vm15 = vmor %vm1346_vm14, %vm1347_vm13 }
 0x6cb   : > { %v1343_v24 = vsub.f32 1.0, %v1342_v23 }
 0x6cd   : > { %v1344_v26 = vmul.f32 %v1766_v22, %v1343_v24 }
 0x6cf   : > { %v1345_v28 = vadd.f32 %v1766_v22, %v1344_v26 }
 0x6d1   : > { %v1349_v31 = vsel %vm1348_vm15, %v1766_v22, %v1345_v28 }
 0x6d2   : > { %v1354_v33 = vsel %vm1351_vm1, %v1353_v29, %v1349_v31 }
 0x6d3   : > { %v1356_v34 = vmul.f32 %v1355_v30, %v1354_v33 }
 0x6d5   : > { %v1360_v36 = vmul.f32 %v1737_v32, %v1356_v34 }
 0x6d7   : > { %v1364_v37 = vadd.f32 %v1738_v35, %v1360_v36 }
 0x6d9   : > { %1625 = vmatmul.msk.f32.vlgmr.msrb.gmra.mxu2 %vm745_vm0, %v1364_v37 }
 0x75c   : > { %v1393_v41 = vpop.f32.mrf.mxu2 }
 0x75d   : > { %v1394_v42 = vadd.f32 %v1739_v40, %v1393_v41 }
 0x75f   : > { %v1396_v43 = vmax.f32 %v1394_v42, 0.0 }
 0x761   : > { %1626 = vmatmul.msk.f32.vlgmr.msrb.gmra.mxu3 %vm1409_vm2, %v1396_v43 }
 0x7e4   : > { %v1430_v45 = vpop.f32.mrf.mxu3 }
 0x7e5   : > { %v1431_v46 = vadd.f32 %v1740_v44, %v1430_v45 }
 0x7e7   : > { %v1433_v47 = vadd.f32 %v1431_v46, %v2402_v54 }
 0x7e9   : > { %1434 = vst.msk [vmem:[%s740_s0] sm:$0xff] %vm745_vm0, %v1433_v47 }
 0x7ea   : > { %1944 = shalt.err (!%p1941_p11)
}
 0x7eb   : > { %1645 = dma.vmem_to_hbm [thread:$0]  (%p2198_p4), %s1450_s17, 128, %s1452_s22, %s1436_s19  }
 0x7ec PF: > { %s2579_s10 = sld [smem:[#allocation16_spill]] }
 0x7ed   : > { %s2581_s18 = sld [smem:[#allocation19_spill]] }
 0x7f2   : > { %s1463_s20 = sand.u32 1, %s2579_s10  }
 0x7f3   : > { %p2582_p12 = scmp.ge.s32.totalorder %s2581_s18, 2  ;;  %s1464_s21 = scalar_lea.sflag [#allocation4], %s1463_s20 }
 0x7f5   : > { %p1665_p13 = pnand %p2582_p12, %p2206_p9 }
 0x7f7   : > { %p1666_p0 = pneg %p1665_p13 }
 0x7f9   : > { %1982 = dma.done.wait (%p1666_p0), %s1464_s21, 128  }
 0x7fa   : > { %1984 = vsyncadd (%p1666_p0), %s1464_s21, 4294967168  ;;  %s39_s22 = sadd.s32 1, %s2581_s18   ;;  %s2583_s3 = sld [smem:[#allocation17_spill]] }
 0x7fb   : > { %p36_p2 = scmp.ge.s32.totalorder %s39_s22, 4   ;;  %s2584_s20 = sld [smem:[#allocation22_spill]] }
 0x7fc   : > { %s2585_s25 = sld [smem:[#allocation20_spill]]  ;;  %s2586_s0 = smov %s1991_s30 }
 0x7fd   : > { %s2588_s21 = smov %s2003_s1 }
 0x7fe   :  { %38 = sbr.rel (!%p36_p2) target bundleno = 28 (0x1c), region = 176 }
 0x800   : > { %s2587_s30 = smov %s2583_s3 }
 0x802   : > { %s2589_s1 = smov %s2585_s25 }
 0x803   :  { %1470 = vsyncpa [#allocation3], 1 }
 0x804   :  { %1472 = vsyncpa [#allocation3 + $0x1], 1 }
 0x805   :  { %1473 = vsyncpa [#allocation6], 1 }
 0x806   :  { %1475 = vsyncpa [#allocation6 + $0x1], 1 }
 0x807   :  { %1476 = vsyncpa [#allocation9], 1 }
 0x808   :  { %1477 = vsyncpa [#allocation4], 1 }
 0x809   :  { %1479 = vsyncpa [#allocation4 + $0x1], 1 }

</bundles_post_ra>
